<compile_context>
chip_gen: v7x
topology: tpu7x:2x2x1
jax: 0.10.0
libtpu: 0.0.40
codegen_flags: <defaults>
</compile_context>

<pallas_src>
import functools

import jax
import jax.numpy as jnp
from jax.experimental import pallas as pl
from jax.experimental.pallas import tpu as pltpu


def _round_up(x: int, m: int) -> int:
    return ((x + m - 1) // m) * m


def _largest_divisor_leq(n: int, cap: int) -> int:
    cap = max(1, min(n, cap))
    best = 1
    for k in range(1, cap + 1):
        if n % k == 0:
            best = k
    return best


def _device_kind() -> str:
    try:
        return jax.devices()[0].device_kind.lower()
    except Exception:
        return ""


def _use_bf16_tanh() -> bool:
    # v6e/v7x have bf16-capable VPU/EUP -> bf16 tanh ~2x the binding EUP slot.
    # v5e and older have no bf16 EUP, so keep the tanh path in f32 there.
    kind = _device_kind()
    return not any(t in kind for t in ("v2", "v3", "v4", "v5"))


def _attention_scores_kernel(e_ref, d_ref, v_ref, out_ref, *,
                             d_model: int, chunk: int, bf16_tanh: bool):
    """One (Te-tile, Td-tile) block of additive-attention scores.

    e_ref:   (B, D, Te_t)     encoder projection, feature-major (Te on lanes)
    d_ref:   (Td_t, B, D)     decoder projection, time-major
    v_ref:   (D, 1)
    out_ref: (Td_t, B, Te_t)  scores, already in the final (Td, B, Te) layout
    """
    acc = jnp.zeros(out_ref.shape, jnp.float32)
    # D-chunked accumulation: one (Td_t, B, chunk, Te_t) slab live at a time
    # (chunk sits on sublanes, Te on lanes) instead of a full-D intermediate.
    for start in range(0, d_model, chunk):
        ch = min(chunk, d_model - start)
        d_c = d_ref[:, :, pl.ds(start, ch)]            # (Td_t, B, ch)
        e_c = e_ref[:, pl.ds(start, ch), :]            # (B, ch, Te_t)
        v_c = v_ref[pl.ds(start, ch), :]               # (ch, 1)
        x = d_c[:, :, :, None] + e_c[None, :, :, :]    # (Td_t, B, ch, Te_t) f32
        if bf16_tanh:
            t = jnp.tanh(x.astype(jnp.bfloat16)).astype(jnp.float32)
        else:
            t = jnp.tanh(x)
        # Weighted reduce over the chunk (sublane axis): lane-dense Te output.
        acc = acc + jnp.sum(t * v_c[None, None, :, :], axis=2)
    out_ref[...] = acc


def attention_forward(encoder_output, decoder_output, W1, W2, v):
    """encoder_output: (Te, B, D), decoder_output: (Td, B, D), time-major f32.
    Returns scores of shape (Td, B, Te) (padded equivalent of the PackedSequence)."""
    Te, B, D = encoder_output.shape
    Td = decoder_output.shape[0]

    kind = _device_kind()
    small_vmem = ("v7" in kind) or ("7x" in kind)     # v7x: 64 MiB VMEM per TC
    bf16_tanh = _use_bf16_tanh()

    # Hoisted projections: one matmul each. Precision.HIGH (3-pass bf16) is
    # near-f32 accurate and much faster than HIGHEST. Output layouts match the
    # kernel operands directly:
    #   e -> (B, D, Te)  feature-major, Te on lanes
    #   d -> (Td, B, D)  time-major (natural layout, no transpose pass)
    prec = jax.lax.Precision.HIGH
    e_bft = jnp.einsum("tbd,df->bft", encoder_output, W1, precision=prec)
    d_tbf = jnp.einsum("tbd,df->tbf", decoder_output, W2, precision=prec)

    # Pad only to the (8, 128) layout granularity, not to the tile size.
    Te_pad = _round_up(Te, 128)
    Td_pad = _round_up(Td, 8)

    # D-chunk size: 8 sublanes; grow only enough to keep the unrolled chunk
    # loop at <= 32 iterations for very large D.
    chunk = 8 * max(1, -(-D // (8 * 32)))

    # Te tile: lane-dense multiple of 128 that divides Te_pad (cap 512 and
    # keep the (B, D, te_tile) e block under ~16 MiB).
    te_units = Te_pad // 128
    te_cap_units = max(1, min(4, (16 * 1024 * 1024) // max(1, B * D * 4 * 128)))
    te_tile = 128 * _largest_divisor_leq(te_units, te_cap_units)

    # Td tile: any divisor of Td_pad (no layout constraint on that axis),
    # capped so the live (Td_t, B, chunk, Te_t) f32 slab fits the per-chip
    # budget (v7x has only 64 MiB VMEM; v5e/v6e have 128 MiB).
    slab_budget = (4 if small_vmem else 8) * 1024 * 1024
    td_cap = max(1, min(512, slab_budget // (B * chunk * te_tile * 4)))
    td_tile = _largest_divisor_leq(Td_pad, td_cap)

    n_te = Te_pad // te_tile
    n_td = Td_pad // td_tile
    # Expose >= 2 parallel grid steps for non-trivial problems so both
    # TensorCores get work on v7x.
    if n_te * n_td == 1 and Td_pad >= 16:
        td_tile = _largest_divisor_leq(Td_pad, max(1, Td_pad // 2))
        n_td = Td_pad // td_tile

    if Te_pad != Te:
        e_bft = jnp.pad(e_bft, ((0, 0), (0, 0), (0, Te_pad - Te)))
    if Td_pad != Td:
        d_tbf = jnp.pad(d_tbf, ((0, Td_pad - Td), (0, 0), (0, 0)))
    v2 = v.reshape(D, 1)

    # Grid: Te-tiles outer, Td-tiles inner -> the (B, D, te_tile) e block stays
    # resident across the inner loop; only the small d block is re-streamed.
    grid = (n_te, n_td)

    cost = pl.CostEstimate(
        flops=3 * B * Td_pad * Te_pad * D,
        transcendentals=B * Td_pad * Te_pad * D,
        bytes_accessed=4 * (B * D * Te_pad              # e, read once
                            + n_te * Td_pad * B * D     # d, re-streamed per Te tile
                            + D                         # v
                            + Td_pad * B * Te_pad),     # scores, written once
    )

    kernel = functools.partial(_attention_scores_kernel,
                               d_model=D, chunk=chunk, bf16_tanh=bf16_tanh)

    out = pl.pallas_call(
        kernel,
        out_shape=jax.ShapeDtypeStruct((Td_pad, B, Te_pad), jnp.float32),
        grid_spec=pltpu.PrefetchScalarGridSpec(
            num_scalar_prefetch=0,
            grid=grid,
            in_specs=[
                pl.BlockSpec((B, D, te_tile), lambda j, i: (0, 0, j)),
                pl.BlockSpec((td_tile, B, D), lambda j, i: (i, 0, 0)),
                pl.BlockSpec((D, 1), lambda j, i: (0, 0)),
            ],
            out_specs=pl.BlockSpec((td_tile, B, te_tile),
                                   lambda j, i: (i, 0, j)),
        ),
        compiler_params=pltpu.CompilerParams(
            dimension_semantics=("parallel", "parallel"),
            vmem_limit_bytes=(32 if small_vmem else 64) * 1024 * 1024,
        ),
        cost_estimate=cost,
    )(e_bft, d_tbf, v2)

    # Output already in the PyTorch scores.transpose(1, 2) layout; drop padding.
    return out[:Td, :, :Te]


def attention_reference(encoder_output, decoder_output, W1, W2, v):
    prec = jax.lax.Precision.HIGH
    e = jnp.einsum("tbd,df->tbf", encoder_output, W1, precision=prec)   # (Te, B, D)
    d = jnp.einsum("tbd,df->tbf", decoder_output, W2, precision=prec)   # (Td, B, D)
    s = jnp.tanh(d[:, None, :, :] + e[None, :, :, :])                   # (Td, Te, B, D)
    scores = jnp.einsum("sebd,d->seb", s, v,
                        precision=jax.lax.Precision.HIGHEST)            # (Td, Te, B)
    return jnp.transpose(scores, (0, 2, 1))                             # (Td, B, Te)


if __name__ == "__main__":
    # Small deterministic setup.
    Te, Td, B, D = 8, 6, 2, 32

    key = jax.random.PRNGKey(0)
    k_enc, k_dec, k_w1, k_w2, k_v = jax.random.split(key, 5)

    encoder_output = jax.random.normal(k_enc, (Te, B, D), dtype=jnp.float32)
    decoder_output = jax.random.normal(k_dec, (Td, B, D), dtype=jnp.float32)
    W1 = jax.random.normal(k_w1, (D, D), dtype=jnp.float32) * (1.0 / jnp.sqrt(D))
    W2 = jax.random.normal(k_w2, (D, D), dtype=jnp.float32) * (1.0 / jnp.sqrt(D))
    v = jax.random.normal(k_v, (D,), dtype=jnp.float32) * (1.0 / jnp.sqrt(D))

    out = attention_forward(encoder_output, decoder_output, W1, W2, v)
    out = jax.block_until_ready(out)

    ref = attention_reference(encoder_output, decoder_output, W1, W2, v)
    assert out.shape == (Td, B, Te), out.shape

    # bf16 tanh on v6e/v7x trades ~1e-2 absolute accuracy for ~2x EUP throughput.
    tol = 5e-2 if _use_bf16_tanh() else 1e-4
    assert jnp.allclose(out, ref, atol=tol, rtol=tol), "mismatch vs reference"

    print("KERNEL_OK")
</pallas_src>

<mosaic_0001>
module attributes {stable_mosaic.version = 11 : i64} {
  func.func @_attention_scores_kernel(%arg0: i32, %arg1: i32, %arg2: memref<2x32x128xf32, #tpu.memory_space<vmem>>, %arg3: memref<8x2x32xf32, #tpu.memory_space<vmem>>, %arg4: memref<32x1xf32, #tpu.memory_space<vmem>>, %arg5: memref<8x2x128xf32, #tpu.memory_space<vmem>>) attributes {dimension_semantics = [#tpu.dimension_semantics<parallel>, #tpu.dimension_semantics<parallel>], iteration_bounds = array<i64: 1, 1>, scalar_prefetch = 0 : i64, scratch_operands = 0 : i64, tpu.core_type = #tpu.core_type<tc>, window_params = [{transform_indices = @transform_0, window_bounds = array<i64: 2, 32, 128>}, {transform_indices = @transform_1, window_bounds = array<i64: 8, 2, 32>}, {pipeline_mode = #tpu.pipeline_mode<synchronous>, transform_indices = @transform_2, window_bounds = array<i64: 32, 1>}, {transform_indices = @transform_3, window_bounds = array<i64: 8, 2, 128>}]} {
    %cst = arith.constant 0.000000e+00 : f32
    %0 = vector.broadcast %cst : f32 to vector<8x2x128xf32>
    %c0 = arith.constant 0 : index
    %c0_0 = arith.constant 0 : index
    %c0_1 = arith.constant 0 : index
    %1 = vector.load %arg3[%c0, %c0_0, %c0_1] : memref<8x2x32xf32, #tpu.memory_space<vmem>>, vector<8x2x8xf32>
    %c0_2 = arith.constant 0 : index
    %c0_3 = arith.constant 0 : index
    %c0_4 = arith.constant 0 : index
    %2 = vector.load %arg2[%c0_2, %c0_3, %c0_4] : memref<2x32x128xf32, #tpu.memory_space<vmem>>, vector<2x8x128xf32>
    %c0_5 = arith.constant 0 : index
    %c0_6 = arith.constant 0 : index
    %3 = vector.load %arg4[%c0_5, %c0_6] : memref<32x1xf32, #tpu.memory_space<vmem>>, vector<8x1xf32>
    %4 = vector.shape_cast %1 : vector<8x2x8xf32> to vector<8x2x8x1xf32>
    %5 = vector.shape_cast %2 : vector<2x8x128xf32> to vector<1x2x8x128xf32>
    %6 = vector.broadcast %4 : vector<8x2x8x1xf32> to vector<8x2x8x128xf32>
    %7 = vector.broadcast %5 : vector<1x2x8x128xf32> to vector<8x2x8x128xf32>
    %8 = arith.addf %6, %7 : vector<8x2x8x128xf32>
    %9 = arith.truncf %8 : vector<8x2x8x128xf32> to vector<8x2x8x128xbf16>
    %10 = math.tanh %9 : vector<8x2x8x128xbf16>
    %11 = arith.extf %10 : vector<8x2x8x128xbf16> to vector<8x2x8x128xf32>
    %12 = vector.shape_cast %3 : vector<8x1xf32> to vector<1x1x8x1xf32>
    %13 = vector.broadcast %12 : vector<1x1x8x1xf32> to vector<8x2x8x128xf32>
    %14 = arith.mulf %11, %13 : vector<8x2x8x128xf32>
    %cst_7 = arith.constant dense<0.000000e+00> : vector<8x2x128xf32>
    %15 = vector.multi_reduction <add>, %14, %cst_7 [2] : vector<8x2x8x128xf32> to vector<8x2x128xf32>
    %16 = arith.addf %0, %15 : vector<8x2x128xf32>
    %c0_8 = arith.constant 0 : index
    %c0_9 = arith.constant 0 : index
    %c8 = arith.constant 8 : index
    %17 = vector.load %arg3[%c0_8, %c0_9, %c8] : memref<8x2x32xf32, #tpu.memory_space<vmem>>, vector<8x2x8xf32>
    %c0_10 = arith.constant 0 : index
    %c8_11 = arith.constant 8 : index
    %c0_12 = arith.constant 0 : index
    %18 = vector.load %arg2[%c0_10, %c8_11, %c0_12] : memref<2x32x128xf32, #tpu.memory_space<vmem>>, vector<2x8x128xf32>
    %c8_13 = arith.constant 8 : index
    %c0_14 = arith.constant 0 : index
    %19 = vector.load %arg4[%c8_13, %c0_14] : memref<32x1xf32, #tpu.memory_space<vmem>>, vector<8x1xf32>
    %20 = vector.shape_cast %17 : vector<8x2x8xf32> to vector<8x2x8x1xf32>
    %21 = vector.shape_cast %18 : vector<2x8x128xf32> to vector<1x2x8x128xf32>
    %22 = vector.broadcast %20 : vector<8x2x8x1xf32> to vector<8x2x8x128xf32>
    %23 = vector.broadcast %21 : vector<1x2x8x128xf32> to vector<8x2x8x128xf32>
    %24 = arith.addf %22, %23 : vector<8x2x8x128xf32>
    %25 = arith.truncf %24 : vector<8x2x8x128xf32> to vector<8x2x8x128xbf16>
    %26 = math.tanh %25 : vector<8x2x8x128xbf16>
    %27 = arith.extf %26 : vector<8x2x8x128xbf16> to vector<8x2x8x128xf32>
    %28 = vector.shape_cast %19 : vector<8x1xf32> to vector<1x1x8x1xf32>
    %29 = vector.broadcast %28 : vector<1x1x8x1xf32> to vector<8x2x8x128xf32>
    %30 = arith.mulf %27, %29 : vector<8x2x8x128xf32>
    %cst_15 = arith.constant dense<0.000000e+00> : vector<8x2x128xf32>
    %31 = vector.multi_reduction <add>, %30, %cst_15 [2] : vector<8x2x8x128xf32> to vector<8x2x128xf32>
    %32 = arith.addf %16, %31 : vector<8x2x128xf32>
    %c0_16 = arith.constant 0 : index
    %c0_17 = arith.constant 0 : index
    %c16 = arith.constant 16 : index
    %33 = vector.load %arg3[%c0_16, %c0_17, %c16] : memref<8x2x32xf32, #tpu.memory_space<vmem>>, vector<8x2x8xf32>
    %c0_18 = arith.constant 0 : index
    %c16_19 = arith.constant 16 : index
    %c0_20 = arith.constant 0 : index
    %34 = vector.load %arg2[%c0_18, %c16_19, %c0_20] : memref<2x32x128xf32, #tpu.memory_space<vmem>>, vector<2x8x128xf32>
    %c16_21 = arith.constant 16 : index
    %c0_22 = arith.constant 0 : index
    %35 = vector.load %arg4[%c16_21, %c0_22] : memref<32x1xf32, #tpu.memory_space<vmem>>, vector<8x1xf32>
    %36 = vector.shape_cast %33 : vector<8x2x8xf32> to vector<8x2x8x1xf32>
    %37 = vector.shape_cast %34 : vector<2x8x128xf32> to vector<1x2x8x128xf32>
    %38 = vector.broadcast %36 : vector<8x2x8x1xf32> to vector<8x2x8x128xf32>
    %39 = vector.broadcast %37 : vector<1x2x8x128xf32> to vector<8x2x8x128xf32>
    %40 = arith.addf %38, %39 : vector<8x2x8x128xf32>
    %41 = arith.truncf %40 : vector<8x2x8x128xf32> to vector<8x2x8x128xbf16>
    %42 = math.tanh %41 : vector<8x2x8x128xbf16>
    %43 = arith.extf %42 : vector<8x2x8x128xbf16> to vector<8x2x8x128xf32>
    %44 = vector.shape_cast %35 : vector<8x1xf32> to vector<1x1x8x1xf32>
    %45 = vector.broadcast %44 : vector<1x1x8x1xf32> to vector<8x2x8x128xf32>
    %46 = arith.mulf %43, %45 : vector<8x2x8x128xf32>
    %cst_23 = arith.constant dense<0.000000e+00> : vector<8x2x128xf32>
    %47 = vector.multi_reduction <add>, %46, %cst_23 [2] : vector<8x2x8x128xf32> to vector<8x2x128xf32>
    %48 = arith.addf %32, %47 : vector<8x2x128xf32>
    %c0_24 = arith.constant 0 : index
    %c0_25 = arith.constant 0 : index
    %c24 = arith.constant 24 : index
    %49 = vector.load %arg3[%c0_24, %c0_25, %c24] : memref<8x2x32xf32, #tpu.memory_space<vmem>>, vector<8x2x8xf32>
    %c0_26 = arith.constant 0 : index
    %c24_27 = arith.constant 24 : index
    %c0_28 = arith.constant 0 : index
    %50 = vector.load %arg2[%c0_26, %c24_27, %c0_28] : memref<2x32x128xf32, #tpu.memory_space<vmem>>, vector<2x8x128xf32>
    %c24_29 = arith.constant 24 : index
    %c0_30 = arith.constant 0 : index
    %51 = vector.load %arg4[%c24_29, %c0_30] : memref<32x1xf32, #tpu.memory_space<vmem>>, vector<8x1xf32>
    %52 = vector.shape_cast %49 : vector<8x2x8xf32> to vector<8x2x8x1xf32>
    %53 = vector.shape_cast %50 : vector<2x8x128xf32> to vector<1x2x8x128xf32>
    %54 = vector.broadcast %52 : vector<8x2x8x1xf32> to vector<8x2x8x128xf32>
    %55 = vector.broadcast %53 : vector<1x2x8x128xf32> to vector<8x2x8x128xf32>
    %56 = arith.addf %54, %55 : vector<8x2x8x128xf32>
    %57 = arith.truncf %56 : vector<8x2x8x128xf32> to vector<8x2x8x128xbf16>
    %58 = math.tanh %57 : vector<8x2x8x128xbf16>
    %59 = arith.extf %58 : vector<8x2x8x128xbf16> to vector<8x2x8x128xf32>
    %60 = vector.shape_cast %51 : vector<8x1xf32> to vector<1x1x8x1xf32>
    %61 = vector.broadcast %60 : vector<1x1x8x1xf32> to vector<8x2x8x128xf32>
    %62 = arith.mulf %59, %61 : vector<8x2x8x128xf32>
    %cst_31 = arith.constant dense<0.000000e+00> : vector<8x2x128xf32>
    %63 = vector.multi_reduction <add>, %62, %cst_31 [2] : vector<8x2x8x128xf32> to vector<8x2x128xf32>
    %64 = arith.addf %48, %63 : vector<8x2x128xf32>
    %c0_32 = arith.constant 0 : index
    %c0_33 = arith.constant 0 : index
    %c0_34 = arith.constant 0 : index
    %65 = vector.load %arg5[%c0_32, %c0_33, %c0_34] : memref<8x2x128xf32, #tpu.memory_space<vmem>>, vector<8x2x128xf32>
    tpu.vector_store %arg5[%c0_32, %c0_33, %c0_34], %64 {strides = array<i32>} : memref<8x2x128xf32, #tpu.memory_space<vmem>>, vector<8x2x128xf32>,
    return
  }
  func.func @transform_0(%arg0: i32, %arg1: i32) -> (i32, i32, i32) {
    %c0_i32 = arith.constant 0 : i32
    %c0_i32_0 = arith.constant 0 : i32
    %c0_i32_1 = arith.constant 0 : i32
    return %c0_i32, %c0_i32_0, %arg0 : i32, i32, i32
  }
  func.func @transform_1(%arg0: i32, %arg1: i32) -> (i32, i32, i32) {
    %c0_i32 = arith.constant 0 : i32
    %c0_i32_0 = arith.constant 0 : i32
    %c0_i32_1 = arith.constant 0 : i32
    return %arg1, %c0_i32, %c0_i32_0 : i32, i32, i32
  }
  func.func @transform_2(%arg0: i32, %arg1: i32) -> (i32, i32) {
    %c0_i32 = arith.constant 0 : i32
    %c0_i32_0 = arith.constant 0 : i32
    %c0_i32_1 = arith.constant 0 : i32
    return %c0_i32, %c0_i32_0 : i32, i32
  }
  func.func @transform_3(%arg0: i32, %arg1: i32) -> (i32, i32, i32) {
    %c0_i32 = arith.constant 0 : i32
    %c0_i32_0 = arith.constant 0 : i32
    return %arg1, %c0_i32, %arg0 : i32, i32, i32
  }
}

</mosaic_0001>

<bundles_post_ra>
// kernel: tpu_custom_call.1
= control target key start
LH: loop header
LB: loop body
LE: loop exit
PB: predicated region body
PF: predicated region fallthrough
CT: control target
= control target key end

     0   :  { %8 = vsyncpa [#allocation3], 0  ;;  %s2265_s0 = inlined_call_operand.hbm [shape: f32[2,32,128], index: 0, kind: input, shape index: {}]   ;;  %s2266_s1 = inlined_call_operand.hbm [shape: f32[8,2,32], index: 1, kind: input, shape index: {}]   ;;  %s2267_s2 = inlined_call_operand.hbm [shape: f32[32,1], index: 2, kind: input, shape index: {}]   ;;  %s2268_s3 = inlined_call_operand.hbm [shape: f32[8,2,128], index: 3, kind: output, shape index: {}]  }
   0x1   :  { %9 = vsyncpa [#allocation6], 0 }
   0x2   :  { %10 = vsyncpa [#allocation4], 0  ;;  %s1460_s12 = smov [#allocation5]   ;;  %s1366_s16 = scalar_lea.hbm %s2266_s1, 256 }
   0x3   :  { %s28_s13 = sshll.u32 %s1460_s12, 4  ;;  %p1367_p0 = scmp.ne.s32.totalorder %s2266_s1, %s1366_s16  ;;  %s29_s13 = int_to_ptr.vmem [resolvable:$true] %s28_s13 }
   0x4   :  { %p1370_p1 = scmp.lt.u32.totalorder %s1366_s16, %s2266_s1 }
   0x6   :  { %p1372_p2 = pnand %p1370_p1, %p1367_p0 }
   0x8   :  { %1375 = shalt.err (!%p1372_p2)
}
   0x9   :  { %s1376_s21 = scalar_lea.vmem %s29_s13, 256  ;;  %p1381_p4 = scmp.lt.s32.totalorder %s29_s13, %s29_s13 }
   0xa   :  { %p1377_p3 = scmp.ne.s32.totalorder %s29_s13, %s1376_s21  ;;  %p1382_p5 = scmp.lt.s32.totalorder %s1376_s21, %s1376_s21 }
   0xc   :  { %p1383_p6 = por %p1382_p5, %p1381_p4 }
   0xe   :  { %p1384_p7 = pnand %p1383_p6, %p1377_p3 }
  0x10   :  { %1387 = shalt.err (!%p1384_p7)
}
  0x11   :  { %s1461_s22 = smov 32   ;;  %s1462_s23 = smov 2  }
  0x12   :  { %34 = dma.hbm_to_vmem [thread:$0]  %s2266_s1, 256, %s29_s13, [#allocation6], %s1461_s22, %s1461_s22, %s1462_s23  }
  0x13   :  { %s1463_s26 = smov [#allocation2]   ;;  %s1388_s30 = scalar_lea.hbm %s2265_s0, 1024 }
  0x14   :  { %s16_s27 = sshll.u32 %s1463_s26, 4  ;;  %p1389_p8 = scmp.ne.s32.totalorder %s2265_s0, %s1388_s30  ;;  %s17_s27 = int_to_ptr.vmem [resolvable:$true] %s16_s27 }
  0x15   :  { %p1392_p9 = scmp.lt.u32.totalorder %s1388_s30, %s2265_s0 }
  0x17   :  { %p1394_p10 = pnand %p1392_p9, %p1389_p8 }
  0x19   :  { %1397 = shalt.err (!%p1394_p10)
}
  0x1a   :  { %s1398_s8 = scalar_lea.vmem %s17_s27, 1024  ;;  %p1403_p12 = scmp.lt.s32.totalorder %s17_s27, %s17_s27 }
  0x1b   :  { %p1399_p11 = scmp.ne.s32.totalorder %s17_s27, %s1398_s8  ;;  %p1404_p13 = scmp.lt.s32.totalorder %s1398_s8, %s1398_s8 }
  0x1d   :  { %p1405_p0 = por %p1404_p13, %p1403_p12 }
  0x1f   :  { %p1406_p1 = pnand %p1405_p0, %p1399_p11 }
  0x21   :  { %1409 = shalt.err (!%p1406_p1)
}
  0x22   :  { %s1464_s1 = smov 128   ;;  %s1465_s9 = smov 8  }
  0x23   :  { %22 = dma.hbm_to_vmem [thread:$0]  %s2265_s0, 1024, %s17_s27, [#allocation3], %s1464_s1, %s1464_s1, %s1465_s9  }
  0x24   :  { %s1466_s12 = smov [#allocation7]   ;;  %s1410_s16 = scalar_lea.hbm %s2267_s2, 512 }
  0x25   :  { %s40_s13 = sshll.u32 %s1466_s12, 4  ;;  %p1411_p2 = scmp.ne.s32.totalorder %s2267_s2, %s1410_s16  ;;  %s41_s13 = int_to_ptr.vmem [resolvable:$true] %s40_s13 }
  0x26   :  { %p1414_p3 = scmp.lt.u32.totalorder %s1410_s16, %s2267_s2 }
  0x28   :  { %p1416_p4 = pnand %p1414_p3, %p1411_p2 }
  0x2a   :  { %1419 = shalt.err (!%p1416_p4)
}
  0x2b   :  { %s1420_s21 = scalar_lea.vmem %s41_s13, 512  ;;  %p1425_p6 = scmp.lt.s32.totalorder %s41_s13, %s41_s13 }
  0x2c   :  { %p1421_p5 = scmp.ne.s32.totalorder %s41_s13, %s1420_s21  ;;  %p1426_p7 = scmp.lt.s32.totalorder %s1420_s21, %s1420_s21 }
  0x2e   :  { %p1427_p8 = por %p1426_p7, %p1425_p6 }
  0x30   :  { %p1428_p9 = pnand %p1427_p8, %p1421_p5 }
  0x32   :  { %1431 = shalt.err (!%p1428_p9)
}
  0x33   :  { %46 = dma.hbm_to_vmem [thread:$0]  %s2267_s2, 512, %s41_s13, [#allocation6], %s1464_s1, %s1464_s1, %s1465_s9  }
  0x34   :  { %1454 = dma.done.wait [#allocation3], 1024  }
  0x35   :  { %1455 = vsyncadd [#allocation3], 4294966272 }
  0x36   :  { %1456 = dma.done.wait [#allocation6], 768  }
  0x37   :  { %1457 = vsyncadd [#allocation6], 4294966528  ;;  %v67_v0 = vlaneseq  ;;  %v1467_v1 = vmov 0   ;;  %v57_v5 = vld [vmem:[#allocation5 + $0x2] sm:$0x3]  ;;  %v66_v29 = vld [vmem:[#allocation7] sm:$0xff] }
  0x38   :  { %1236 = vset.pattern.permute.xlu0 %v1467_v1  ;;  %1237 = vset.pattern.permute.xlu1 %v1467_v1  ;;  %v56_v6 = vld [vmem:[#allocation5] sm:$0x3]  ;;  %v58_v11 = vld [vmem:[#allocation5 + $0x4] sm:$0x3]  ;;  %v59_v14 = vld [vmem:[#allocation5 + $0x6] sm:$0x3] }
  0x39   :  { %v68_v2 = vshrl.u32 %v67_v0, 7  ;;  %v60_v17 = vld [vmem:[#allocation5 + $0x8] sm:$0x3]  ;;  %v61_v20 = vld [vmem:[#allocation5 + $0xa] sm:$0x3]  ;;  %v1586_v34 = vld [vmem:[#allocation2] sm:$0xff] }
  0x3a   :  { %v62_v23 = vld [vmem:[#allocation5 + $0xc] sm:$0x3]  ;;  %v63_v26 = vld [vmem:[#allocation5 + $0xe] sm:$0x3]  ;;  %v65_v38 = vld [vmem:[#allocation2 + $0x20] sm:$0xff]  ;;  %vm1184_vm0 = vcmask 1041409  }
  0x3b   :  { %v69_v3 = vsub.s32 0, %v68_v2  ;;  %v76_v4 = vsub.s32 1, %v68_v2  ;;  %v378_v40 = vld [vmem:[#allocation7 + $0x8] sm:$0xff]  ;;  %v642_v49 = vld [vmem:[#allocation7 + $0x10] sm:$0xff]  ;;  %v906_v50 = vld [vmem:[#allocation7 + $0x18] sm:$0xff]  ;;  %s1468_s2 = smov [#allocation8]  }
  0x3c   :  { %s1214_s25 = sshll.u32 %s1468_s2, 4  ;;  %s1215_s25 = int_to_ptr.vmem [resolvable:$true] %s1214_s25 }
  0x3d   :  { %v1528_v7 = vrot.slane %v57_v5, %v69_v3  ;;  %v1530_v8 = vrot.slane %v56_v6, %v69_v3  ;;  %v1534_v9 = vrot.slane %v57_v5, %v76_v4  ;;  %v1536_v10 = vrot.slane %v56_v6, %v76_v4  ;;  %s1432_s26 = scalar_lea.vmem %s1215_s25, 256  ;;  %p1437_p11 = scmp.lt.s32.totalorder %s1215_s25, %s1215_s25 }
  0x3e   :  { %v1540_v12 = vrot.slane %v58_v11, %v76_v4  ;;  %v1542_v13 = vrot.slane %v58_v11, %v69_v3  ;;  %v1546_v15 = vrot.slane %v59_v14, %v76_v4  ;;  %v112_v16 = vrot.slane %v59_v14, %v69_v3  ;;  %p1433_p10 = scmp.ne.s32.totalorder %s1215_s25, %s1432_s26  ;;  %p1438_p12 = scmp.lt.s32.totalorder %s1432_s26, %s1432_s26 }
  0x3f   :  { %86 = vbcast.lane.b32.xlu1 %v1528_v7, 256  ;;  %72 = vbcast.lane.b32.xlu0 %v1530_v8, 256  ;;  %v1549_v18 = vrot.slane %v60_v17, %v76_v4  ;;  %v126_v19 = vrot.slane %v60_v17, %v69_v3  ;;  %v147_v21 = vrot.slane %v61_v20, %v76_v4 }
  0x40   :  { %v140_v22 = vrot.slane %v61_v20, %v69_v3  ;;  %v1552_v24 = vrot.slane %v62_v23, %v76_v4  ;;  %v154_v25 = vrot.slane %v62_v23, %v69_v3  ;;  %v1555_v27 = vrot.slane %v63_v26, %v76_v4  ;;  %p1439_p13 = por %p1438_p12, %p1437_p11 }
  0x41   :  { %v168_v28 = vrot.slane %v63_v26, %v69_v3 }
  0x42   :  { %p1440_p0 = pnand %p1439_p13, %p1433_p10 }
  0x43   :  { %93 = vbcast.lane.b32.xlu1 %v1534_v9, 256  ;;  %79 = vbcast.lane.b32.xlu0 %v1536_v10, 256 }
  0x47   :  { %107 = vbcast.lane.b32.xlu1 %v1540_v12, 256  ;;  %100 = vbcast.lane.b32.xlu0 %v1542_v13, 256 }
  0x4b   :  { %121 = vbcast.lane.b32.xlu1 %v1546_v15, 256  ;;  %114 = vbcast.lane.b32.xlu0 %v112_v16, 256 }
  0x4f   :  { %135 = vbcast.lane.b32.xlu1 %v1549_v18, 256  ;;  %128 = vbcast.lane.b32.xlu0 %v126_v19, 256 }
  0x53   :  { %149 = vbcast.lane.b32.xlu1 %v147_v21, 256  ;;  %142 = vbcast.lane.b32.xlu0 %v140_v22, 256 }
  0x57   :  { %163 = vbcast.lane.b32.xlu1 %v1552_v24, 256  ;;  %156 = vbcast.lane.b32.xlu0 %v154_v25, 256 }
  0x5b   :  { %177 = vbcast.lane.b32.xlu1 %v1555_v27, 256  ;;  %170 = vbcast.lane.b32.xlu0 %v168_v28, 256 }
  0x5f   :  { %381 = vbcast.lane.b32.xlu1 %v1530_v8, 264  ;;  %245 = vperm.xlu0 %1236, %v66_v29  }
  0x63   :  { %385 = vbcast.lane.b32.xlu1 %v1536_v10, 264  ;;  %389 = vbcast.lane.b32.xlu0 %v1528_v7, 264 }
  0x67   :  { %393 = vbcast.lane.b32.xlu1 %v1534_v9, 264  ;;  %397 = vbcast.lane.b32.xlu0 %v1542_v13, 264 }
  0x6b   :  { %401 = vbcast.lane.b32.xlu1 %v1540_v12, 264  ;;  %405 = vbcast.lane.b32.xlu0 %v112_v16, 264 }
  0x6f   :  { %409 = vbcast.lane.b32.xlu1 %v1546_v15, 264  ;;  %413 = vbcast.lane.b32.xlu0 %v126_v19, 264 }
  0x73   :  { %417 = vbcast.lane.b32.xlu1 %v1549_v18, 264  ;;  %421 = vbcast.lane.b32.xlu0 %v140_v22, 264 }
  0x77   :  { %425 = vbcast.lane.b32.xlu1 %v147_v21, 264  ;;  %429 = vbcast.lane.b32.xlu0 %v154_v25, 264 }
  0x7b   :  { %433 = vbcast.lane.b32.xlu1 %v1552_v24, 264  ;;  %437 = vbcast.lane.b32.xlu0 %v168_v28, 264 }
  0x7f   :  { %441 = vbcast.lane.b32.xlu1 %v1555_v27, 264  ;;  %645 = vbcast.lane.b32.xlu0 %v1530_v8, 272 }
  0x83   :  { %649 = vbcast.lane.b32.xlu1 %v1536_v10, 272  ;;  %653 = vbcast.lane.b32.xlu0 %v1528_v7, 272 }
  0x87   :  { %657 = vbcast.lane.b32.xlu1 %v1534_v9, 272  ;;  %661 = vbcast.lane.b32.xlu0 %v1542_v13, 272 }
  0x8b   :  { %665 = vbcast.lane.b32.xlu1 %v1540_v12, 272  ;;  %669 = vbcast.lane.b32.xlu0 %v112_v16, 272 }
  0x8f   :  { %673 = vbcast.lane.b32.xlu1 %v1546_v15, 272  ;;  %677 = vbcast.lane.b32.xlu0 %v126_v19, 272 }
  0x93   :  { %681 = vbcast.lane.b32.xlu1 %v1549_v18, 272  ;;  %685 = vbcast.lane.b32.xlu0 %v140_v22, 272 }
  0x97   :  { %689 = vbcast.lane.b32.xlu1 %v147_v21, 272  ;;  %693 = vbcast.lane.b32.xlu0 %v154_v25, 272 }
  0x9b   :  { %697 = vbcast.lane.b32.xlu1 %v1552_v24, 272  ;;  %701 = vbcast.lane.b32.xlu0 %v168_v28, 272 }
  0x9f   :  { %705 = vbcast.lane.b32.xlu1 %v1555_v27, 272  ;;  %909 = vbcast.lane.b32.xlu0 %v1530_v8, 280 }
  0xa3   :  { %913 = vbcast.lane.b32.xlu1 %v1536_v10, 280  ;;  %917 = vbcast.lane.b32.xlu0 %v1528_v7, 280 }
  0xa7   :  { %921 = vbcast.lane.b32.xlu1 %v1534_v9, 280  ;;  %925 = vbcast.lane.b32.xlu0 %v1542_v13, 280 }
  0xab   :  { %929 = vbcast.lane.b32.xlu1 %v1540_v12, 280  ;;  %933 = vbcast.lane.b32.xlu0 %v112_v16, 280 }
  0xaf   :  { %937 = vbcast.lane.b32.xlu1 %v1546_v15, 280  ;;  %941 = vbcast.lane.b32.xlu0 %v126_v19, 280 }
  0xb1   :  { %v87_v30 = vpop.permute.xlu1 %86  ;;  %v73_v31 = vpop.permute.xlu0 %72 }
  0xb2   :  { %v181_v37 = vadd.f32 %v87_v30, %v1586_v34  ;;  %v179_v39 = vadd.f32 %v73_v31, %v1586_v34 }
  0xb3   :  { %945 = vbcast.lane.b32.xlu1 %v1549_v18, 280  ;;  %949 = vbcast.lane.b32.xlu0 %v140_v22, 280 }
  0xb4   :  { %v197_v45 = vpack.c.bf16 %v181_v37, %v181_v37  ;;  %v195_v47 = vpack.c.bf16 %v179_v39, %v179_v39 }
  0xb5   :  { %v94_v32 = vpop.permute.xlu1 %93  ;;  %v80_v33 = vpop.permute.xlu0 %79 }
  0xb6   :  { %v182_v41 = vadd.f32 %v94_v32, %v65_v38  ;;  %v180_v44 = vadd.f32 %v80_v33, %v65_v38  ;;  %1238 = vtanh.bf16 %v197_v45 }
  0xb7   :  { %953 = vbcast.lane.b32.xlu1 %v147_v21, 280  ;;  %957 = vbcast.lane.b32.xlu0 %v154_v25, 280  ;;  %1240 = vtanh.bf16 %v195_v47 }
  0xb8   :  { %v198_v51 = vpack.c.bf16 %v182_v41, %v182_v41  ;;  %v196_v55 = vpack.c.bf16 %v180_v44, %v180_v44 }
  0xb9   :  { %v108_v35 = vpop.permute.xlu1 %107  ;;  %v101_v36 = vpop.permute.xlu0 %100 }
  0xba   :  { %v184_v46 = vadd.f32 %v108_v35, %v65_v38  ;;  %v183_v48 = vadd.f32 %v101_v36, %v1586_v34  ;;  %1242 = vtanh.bf16 %v198_v51 }
  0xbb   :  { %961 = vbcast.lane.b32.xlu1 %v1552_v24, 280  ;;  %965 = vbcast.lane.b32.xlu0 %v168_v28, 280  ;;  %1244 = vtanh.bf16 %v196_v55 }
  0xbc   :  { %v200_v57 = vpack.c.bf16 %v184_v46, %v184_v46  ;;  %v199_v59 = vpack.c.bf16 %v183_v48, %v183_v48 }
  0xbd   :  { %v122_v42 = vpop.permute.xlu1 %121  ;;  %v115_v43 = vpop.permute.xlu0 %114 }
  0xbe   :  { %v186_v52 = vadd.f32 %v122_v42, %v65_v38  ;;  %v185_v56 = vadd.f32 %v115_v43, %v1586_v34  ;;  %1246 = vtanh.bf16 %v200_v57 }
  0xbf   :  { %969 = vbcast.lane.b32.xlu1 %v1555_v27, 280  ;;  %509 = vperm.xlu0 %1236, %v378_v40   ;;  %1248 = vtanh.bf16 %v199_v59 }
  0xc0   :  { %v202_v61 = vpack.c.bf16 %v186_v52, %v186_v52  ;;  %v201_v0 = vpack.c.bf16 %v185_v56, %v185_v56 }
  0xc1   :  { %v136_v53 = vpop.permute.xlu1 %135  ;;  %v129_v54 = vpop.permute.xlu0 %128 }
  0xc2   :  { %v188_v58 = vadd.f32 %v136_v53, %v65_v38  ;;  %v187_v60 = vadd.f32 %v129_v54, %v1586_v34  ;;  %1250 = vtanh.bf16 %v202_v61  ;;  %v1239_v15 = vpop.eup %1238 }
  0xc3   :  { %773 = vperm.xlu1 %1237, %v642_v49   ;;  %1037 = vperm.xlu0 %1236, %v906_v50   ;;  %1252 = vtanh.bf16 %v201_v0  ;;  %v1241_v18 = vpop.eup %1240  ;;  %v229_v36 = vunpack.c.l.bf16 %v1239_v15 }
  0xc4   :  { %v204_v3 = vpack.c.bf16 %v188_v58, %v188_v58  ;;  %v203_v4 = vpack.c.bf16 %v187_v60, %v187_v60  ;;  %v227_v37 = vunpack.c.l.bf16 %v1241_v18 }
  0xc5   :  { %v150_v62 = vpop.permute.xlu1 %149  ;;  %v143_v63 = vpop.permute.xlu0 %142 }
  0xc6   :  { %v190_v1 = vadd.f32 %v150_v62, %v65_v38  ;;  %v189_v2 = vadd.f32 %v143_v63, %v1586_v34  ;;  %1254 = vtanh.bf16 %v204_v3  ;;  %v1243_v19 = vpop.eup %1242 }
  0xc7   :  { %1256 = vtanh.bf16 %v203_v4  ;;  %v1245_v22 = vpop.eup %1244 }
  0xc8   :  { %v206_v5 = vpack.c.bf16 %v190_v1, %v190_v1  ;;  %v205_v8 = vpack.c.bf16 %v189_v2, %v189_v2  ;;  %v228_v39 = vunpack.c.l.bf16 %v1245_v22 }
  0xc9   :  { %v164_v6 = vpop.permute.xlu1 %163  ;;  %v157_v7 = vpop.permute.xlu0 %156 }
  0xca   :  { %v192_v9 = vadd.f32 %v164_v6, %v65_v38  ;;  %v191_v10 = vadd.f32 %v157_v7, %v1586_v34  ;;  %1258 = vtanh.bf16 %v206_v5  ;;  %v1247_v24 = vpop.eup %1246 }
  0xcb   :  { %1260 = vtanh.bf16 %v205_v8  ;;  %v1249_v25 = vpop.eup %1248  ;;  %v232_v40 = vunpack.c.l.bf16 %v1247_v24 }
  0xcc   :  { %v208_v11 = vpack.c.bf16 %v192_v9, %v192_v9  ;;  %v207_v12 = vpack.c.bf16 %v191_v10, %v191_v10  ;;  %v231_v41 = vunpack.c.l.bf16 %v1249_v25 }
  0xcd   :  { %v178_v13 = vpop.permute.xlu1 %177  ;;  %v171_v14 = vpop.permute.xlu0 %170 }
  0xce   :  { %v194_v16 = vadd.f32 %v178_v13, %v65_v38  ;;  %v193_v17 = vadd.f32 %v171_v14, %v1586_v34  ;;  %1262 = vtanh.bf16 %v208_v11  ;;  %v1251_v26 = vpop.eup %1250  ;;  %v230_v38 = vunpack.c.l.bf16 %v1243_v19  ;;  %v1624_v14 = vld [vmem:[#allocation2 + $0x8] sm:$0xff] }
  0xcf   :  { %1264 = vtanh.bf16 %v207_v12  ;;  %v1253_v27 = vpop.eup %1252  ;;  %v234_v43 = vunpack.c.l.bf16 %v1251_v26 }
  0xd0   :  { %v210_v20 = vpack.c.bf16 %v194_v16, %v194_v16  ;;  %v209_v21 = vpack.c.bf16 %v193_v17, %v193_v17  ;;  %v233_v44 = vunpack.c.l.bf16 %v1253_v27  ;;  %v1629_v17 = vld [vmem:[#allocation2 + $0x28] sm:$0xff] }
  0xd1   :  { %v382_v23 = vpop.permute.xlu1 %381  ;;  %v1255_v29 = vpop.eup %1254 }
  0xd2   :  { %1266 = vtanh.bf16 %v210_v20  ;;  %v1257_v30 = vpop.eup %1256  ;;  %v236_v45 = vunpack.c.l.bf16 %v1255_v29  ;;  %v443_v16 = vadd.f32 %v382_v23, %v1624_v14 }
  0xd3   :  { %1268 = vtanh.bf16 %v209_v21  ;;  %v235_v46 = vunpack.c.l.bf16 %v1257_v30 }
  0xd4   :  { %v459_v21 = vpack.c.bf16 %v443_v16, %v443_v16 }
  0xd5   :  { %v386_v28 = vpop.permute.xlu1 %385  ;;  %v1259_v31 = vpop.eup %1258 }
  0xd6   :  { %v1261_v32 = vpop.eup %1260  ;;  %v238_v49 = vunpack.c.l.bf16 %v1259_v31  ;;  %v444_v19 = vadd.f32 %v386_v28, %v1629_v17  ;;  %1270 = vtanh.bf16 %v459_v21 }
  0xd7   :  { %v237_v50 = vunpack.c.l.bf16 %v1261_v32 }
  0xd8   :  { %v460_v27 = vpack.c.bf16 %v444_v19, %v444_v19 }
  0xd9   :  { %v394_v33 = vpop.permute.xlu1 %393  ;;  %v1263_v34 = vpop.eup %1262 }
  0xda   :  { %v1265_v35 = vpop.eup %1264  ;;  %v240_v51 = vunpack.c.l.bf16 %v1263_v34  ;;  %v446_v22 = vadd.f32 %v394_v33, %v1629_v17  ;;  %1272 = vtanh.bf16 %v460_v27 }
  0xdb   :  { %v239_v52 = vunpack.c.l.bf16 %v1265_v35 }
  0xdc   :  { %v462_v30 = vpack.c.bf16 %v446_v22, %v446_v22 }
  0xdd   :  { %v1267_v42 = vpop.eup %1266  ;;  %v402_v47 = vpop.permute.xlu1 %401 }
  0xde   :  { %v1269_v48 = vpop.eup %1268  ;;  %v246_v53 = vpop.permute.xlu0 %245  ;;  %v242_v54 = vunpack.c.l.bf16 %v1267_v42  ;;  %v448_v25 = vadd.f32 %v402_v47, %v1629_v17  ;;  %1274 = vtanh.bf16 %v462_v30 }
  0xdf   :  { %v248_v55 = vmul.f32 %v246_v53, %v227_v37  ;;  %v249_v56 = vmul.f32 %v246_v53, %v228_v39  ;;  %v250_v57 = vmul.f32 %v246_v53, %v229_v36  ;;  %v241_v58 = vunpack.c.l.bf16 %v1269_v48 }
  0xe0   :  { %v1598_v59 = vmul.f32 %v246_v53, %v230_v38  ;;  %v1600_v60 = vmul.f32 %v246_v53, %v231_v41  ;;  %v1602_v61 = vmul.f32 %v246_v53, %v232_v40  ;;  %v1604_v63 = vmul.f32 %v246_v53, %v233_v44 }
  0xe1   :  { %v410_v62 = vpop.permute.xlu1 %409  ;;  %v1606_v0 = vmul.f32 %v246_v53, %v234_v43  ;;  %v1608_v1 = vmul.f32 %v246_v53, %v235_v46  ;;  %v1610_v2 = vmul.f32 %v246_v53, %v236_v45  ;;  %v1612_v4 = vmul.f32 %v246_v53, %v237_v50 }
  0xe2   :  { %v390_v3 = vpop.permute.xlu0 %389  ;;  %v1614_v5 = vmul.f32 %v246_v53, %v238_v49  ;;  %v1616_v6 = vmul.f32 %v246_v53, %v239_v52  ;;  %v1618_v7 = vmul.f32 %v246_v53, %v240_v51  ;;  %v1620_v8 = vmul.f32 %v246_v53, %v241_v58  ;;  %v1663_v58 = vpop.eup %1270 }
  0xe3   :  { %v1622_v9 = vmul.f32 %v246_v53, %v242_v54  ;;  %v450_v26 = vadd.f32 %v410_v62, %v1629_v17  ;;  %v264_v23 = vrot.slane %v248_v55, 4  ;;  %v270_v28 = vrot.slane %v249_v56, 4 }
  0xe4   :  { %v464_v32 = vpack.c.bf16 %v448_v25, %v448_v25  ;;  %v445_v34 = vadd.f32 %v390_v3, %v1624_v14  ;;  %v276_v35 = vrot.slane %v250_v57, 4  ;;  %v282_v42 = vrot.slane %v1598_v59, 4 }
  0xe5   :  { %v418_v10 = vpop.permute.xlu1 %417  ;;  %v466_v33 = vpack.c.bf16 %v450_v26, %v450_v26  ;;  %v265_v39 = vadd.f32 %v264_v23, %v248_v55  ;;  %v271_v41 = vadd.f32 %v270_v28, %v249_v56  ;;  %v288_v46 = vrot.slane %v1600_v60, 4  ;;  %v1670_v21 = vpop.eup %1272 }
  0xe6   :  { %v398_v11 = vpop.permute.xlu0 %397  ;;  %v452_v36 = vadd.f32 %v418_v10, %v1629_v17  ;;  %1276 = vtanh.bf16 %v464_v32  ;;  %v461_v43 = vpack.c.bf16 %v445_v34, %v445_v34  ;;  %v277_v44 = vadd.f32 %v276_v35, %v250_v57 }
  0xe7   :  { %v447_v37 = vadd.f32 %v398_v11, %v1624_v14  ;;  %1278 = vtanh.bf16 %v466_v33  ;;  %v266_v50 = vrot.slane %v265_v39, 2  ;;  %v294_v51 = vrot.slane %v1602_v61, 4 }
  0xe8   :  { %v468_v45 = vpack.c.bf16 %v452_v36, %v452_v36  ;;  %v272_v54 = vrot.slane %v271_v41, 2  ;;  %v283_v55 = vadd.f32 %v282_v42, %v1598_v59  ;;  %1280 = vtanh.bf16 %v461_v43 }
  0xe9   :  { %v426_v12 = vpop.permute.xlu1 %425  ;;  %v463_v47 = vpack.c.bf16 %v447_v37, %v447_v37  ;;  %v278_v56 = vrot.slane %v277_v44, 2  ;;  %v289_v57 = vadd.f32 %v288_v46, %v1600_v60  ;;  %v267_v10 = vadd.f32 %v266_v50, %v265_v39  ;;  %v1675_v26 = vpop.eup %1274  ;;  %v1696_v46 = vld [vmem:[#allocation2 + $0x30] sm:$0xff] }
  0xea   :  { %v406_v13 = vpop.permute.xlu0 %405  ;;  %v454_v48 = vadd.f32 %v426_v12, %v1629_v17  ;;  %1282 = vtanh.bf16 %v468_v45  ;;  %v295_v11 = vadd.f32 %v294_v51, %v1602_v61  ;;  %v273_v16 = vadd.f32 %v272_v54, %v271_v41 }
  0xeb   :  { %v449_v52 = vadd.f32 %v406_v13, %v1624_v14  ;;  %1284 = vtanh.bf16 %v463_v47  ;;  %v284_v19 = vrot.slane %v283_v55, 2  ;;  %v279_v59 = vadd.f32 %v278_v56, %v277_v44 }
  0xec   :  { %v470_v62 = vpack.c.bf16 %v454_v48, %v454_v48  ;;  %v290_v25 = vrot.slane %v289_v57, 2  ;;  %v268_v61 = vrot.slane %v267_v10, 1  ;;  %v296_v23 = vrot.slane %v295_v11, 2 }
  0xed   :  { %v1626_v15 = vpop.permute.xlu1 %433  ;;  %v465_v12 = vpack.c.bf16 %v449_v52, %v449_v52  ;;  %v300_v30 = vrot.slane %v1604_v63, 4  ;;  %v274_v35 = vrot.slane %v273_v16, 1  ;;  %v280_v39 = vrot.slane %v279_v59, 1 }
  0xee   :  { %v1631_v18 = vpop.permute.xlu0 %413  ;;  %v456_v60 = vadd.f32 %v1626_v15, %v1629_v17  ;;  %1286 = vtanh.bf16 %v470_v62  ;;  %v285_v15 = vadd.f32 %v284_v19, %v283_v55  ;;  %v306_v41 = vrot.slane %v1606_v0, 4 }
  0xef   :  { %1288 = vtanh.bf16 %v465_v12  ;;  %v451_v32 = vadd.f32 %v1631_v18, %v1624_v14  ;;  %v291_v44 = vadd.f32 %v290_v25, %v289_v57  ;;  %v1700_v48 = vadd.f32 %v268_v61, %v267_v10 }
  0xf0   :  { %v472_v43 = vpack.c.bf16 %v456_v60, %v456_v60  ;;  %v297_v50 = vadd.f32 %v296_v23, %v295_v11  ;;  %v1707_v54 = vadd.f32 %v274_v35, %v273_v16  ;;  %v312_v55 = vrot.slane %v1608_v1, 4 }
  0xf1   :  { %v1634_v20 = vpop.permute.xlu1 %441  ;;  %v1680_v28 = vpop.eup %1276  ;;  %v467_v51 = vpack.c.bf16 %v451_v32, %v451_v32  ;;  %v1713_v10 = vadd.f32 %v280_v39, %v279_v59  ;;  %v307_v11 = vadd.f32 %v306_v41, %v1606_v0  ;;  %v292_v19 = vrot.slane %v291_v44, 1  ;;  %v1730_v39 = vld [vmem:[#allocation2 + $0x10] sm:$0xff] }
  0xf2   :  { %v1637_v24 = vpop.permute.xlu0 %421  ;;  %v1686_v33 = vpop.eup %1278  ;;  %v458_v37 = vadd.f32 %v1634_v20, %v1629_v17  ;;  %v301_v17 = vadd.f32 %v300_v30, %v1604_v63  ;;  %1290 = vtanh.bf16 %v472_v43  ;;  %v298_v23 = vrot.slane %v297_v50, 1 }
  0xf3   :  { %v453_v18 = vadd.f32 %v1637_v24, %v1624_v14  ;;  %v1703_v20 = vpop.eup %1280  ;;  %v286_v24 = vrot.slane %v285_v15, 1  ;;  %1292 = vtanh.bf16 %v467_v51  ;;  %v313_v35 = vadd.f32 %v312_v55, %v1608_v1 }
  0xf4   :  { %v474_v62 = vpack.c.bf16 %v458_v37, %v458_v37  ;;  %v302_v30 = vrot.slane %v301_v17, 2  ;;  %v318_v57 = vrot.slane %v1610_v2, 4 }
  0xf5   :  { %v1641_v29 = vpop.permute.xlu1 %649  ;;  %v1710_v56 = vpop.eup %1282  ;;  %v469_v12 = vpack.c.bf16 %v453_v18, %v453_v18  ;;  %v1724_v32 = vadd.f32 %v286_v24, %v285_v15  ;;  %v1736_v15 = vadd.f32 %v292_v19, %v291_v44 }
  0xf6   :  { %v1643_v31 = vpop.permute.xlu0 %429  ;;  %v1716_v63 = vpop.eup %1284  ;;  %v708_v16 = vadd.f32 %v1641_v29, %v1696_v46  ;;  %1294 = vtanh.bf16 %v474_v62  ;;  %v303_v62 = vadd.f32 %v302_v30, %v301_v17 }
  0xf7   :  { %v455_v25 = vadd.f32 %v1643_v31, %v1624_v14  ;;  %v308_v31 = vrot.slane %v307_v11, 2  ;;  %1296 = vtanh.bf16 %v469_v12  ;;  %2291 = vst [vmem:[#allocation12_spill] sm:$0xff] %v1736_v15 }
  0xf8   :  { %v724_v43 = vpack.c.bf16 %v708_v16, %v708_v16  ;;  %v314_v16 = vrot.slane %v313_v35, 2  ;;  %v304_v45 = vrot.slane %v303_v62, 1 }
  0xf9   :  { %v1648_v38 = vpop.permute.xlu1 %657  ;;  %v1732_v41 = vpop.eup %1286  ;;  %v471_v1 = vpack.c.bf16 %v455_v25, %v455_v25 }
  0xfa   :  { %v1650_v40 = vpop.permute.xlu0 %437  ;;  %v710_v29 = vadd.f32 %v1648_v38, %v1696_v46  ;;  %v1738_v51 = vpop.eup %1288  ;;  %v1742_v38 = vadd.f32 %v298_v23, %v297_v50  ;;  %1298 = vtanh.bf16 %v724_v43 }
  0xfb   :  { %v457_v18 = vadd.f32 %v1650_v40, %v1624_v14  ;;  %v324_v14 = vrot.slane %v1612_v4, 4  ;;  %1300 = vtanh.bf16 %v471_v1 }
  0xfc   :  { %2292 = vst [vmem:[#allocation13_spill] sm:$0xff] %v1742_v38  ;;  %v726_v44 = vpack.c.bf16 %v710_v29, %v710_v29 }
  0xfd   :  { %v1655_v49 = vpop.permute.xlu1 %665  ;;  %v473_v17 = vpack.c.bf16 %v457_v18, %v457_v18  ;;  %v1763_v43 = vpop.eup %1290 }
  0xfe   :  { %v1659_v53 = vpop.permute.xlu0 %645  ;;  %v712_v24 = vadd.f32 %v1655_v49, %v1696_v46  ;;  %v309_v49 = vadd.f32 %v308_v31, %v307_v11  ;;  %v1758_v11 = vadd.f32 %v314_v16, %v313_v35  ;;  %v1761_v31 = vadd.f32 %v318_v57, %v1610_v2  ;;  %v1772_v35 = vpop.eup %1292 }
  0xff   :  { %v707_v59 = vadd.f32 %v1659_v53, %v1730_v39  ;;  %1302 = vtanh.bf16 %v726_v44  ;;  %v330_v16 = vrot.slane %v1614_v5, 4 }
 0x100   :  { %v728_v25 = vpack.c.bf16 %v712_v24, %v712_v24  ;;  %1304 = vtanh.bf16 %v473_v17  ;;  %v1780_v17 = vld [vmem:[#allocation2 + $0x38] sm:$0xff] }
 0x101   :  { %v1665_v3 = vpop.permute.xlu1 %673  ;;  %v723_v40 = vpack.c.bf16 %v707_v59, %v707_v59  ;;  %v1776_v44 = vpop.eup %1294 }
 0x102   :  { %v1668_v13 = vpop.permute.xlu0 %653  ;;  %v714_v19 = vadd.f32 %v1665_v3, %v1696_v46  ;;  %1306 = vtanh.bf16 %v728_v25  ;;  %v1785_v25 = vadd.f32 %v304_v45, %v303_v62  ;;  %v316_v45 = vrot.slane %v1758_v11, 1 }
 0x103   :  { %v709_v53 = vadd.f32 %v1668_v13, %v1730_v39  ;;  %1308 = vtanh.bf16 %v723_v40 }
 0x104   :  { %v730_v13 = vpack.c.bf16 %v714_v19, %v714_v19  ;;  %2293 = vst [vmem:[#allocation14_spill] sm:$0xff] %v1785_v25 }
 0x105   :  { %v1677_v27 = vpop.permute.xlu1 %681  ;;  %v725_v1 = vpack.c.bf16 %v709_v53, %v709_v53 }
 0x106   :  { %v1684_v34 = vpop.permute.xlu0 %661  ;;  %v716_v23 = vadd.f32 %v1677_v27, %v1696_v46  ;;  %v310_v27 = vrot.slane %v309_v49, 1  ;;  %1310 = vtanh.bf16 %v730_v13 }
 0x107   :  { %v711_v29 = vadd.f32 %v1684_v34, %v1730_v39  ;;  %v1770_v34 = vadd.f32 %v324_v14, %v1612_v4  ;;  %v1782_v14 = vpop.eup %1296  ;;  %1312 = vtanh.bf16 %v725_v1  ;;  %v1797_v1 = vld [vmem:[#allocation2 + $0x18] sm:$0xff] }
 0x108   :  { %v732_v2 = vpack.c.bf16 %v716_v23, %v716_v23  ;;  %v1790_v37 = vadd.f32 %v310_v27, %v309_v49 }
 0x109   :  { %v1698_v47 = vpop.permute.xlu1 %689  ;;  %v727_v19 = vpack.c.bf16 %v711_v29, %v711_v29 }
 0x10a   :  { %v1705_v52 = vpop.permute.xlu0 %669  ;;  %v718_v18 = vadd.f32 %v1698_v47, %v1696_v46  ;;  %1314 = vtanh.bf16 %v732_v2  ;;  %2294 = vst [vmem:[#allocation15_spill] sm:$0xff] %v1790_v37 }
 0x10b   :  { %v713_v59 = vadd.f32 %v1705_v52, %v1730_v39  ;;  %1316 = vtanh.bf16 %v727_v19 }
 0x10c   :  { %v734_v53 = vpack.c.bf16 %v718_v18, %v718_v18 }
 0x10d   :  { %v698_v61 = vpop.permute.xlu1 %697  ;;  %v729_v50 = vpack.c.bf16 %v713_v59, %v713_v59 }
 0x10e   :  { %v678_v0 = vpop.permute.xlu0 %677  ;;  %v720_v57 = vadd.f32 %v698_v61, %v1696_v46  ;;  %1318 = vtanh.bf16 %v734_v53 }
 0x10f   :  { %v715_v52 = vadd.f32 %v678_v0, %v1730_v39  ;;  %1320 = vtanh.bf16 %v729_v50 }
 0x110   :  { %v736_v29 = vpack.c.bf16 %v720_v57, %v720_v57 }
 0x111   :  { %v706_v55 = vpop.permute.xlu1 %705  ;;  %v731_v13 = vpack.c.bf16 %v715_v52, %v715_v52  ;;  %v1806_v52 = vadd.f32 %v330_v16, %v1614_v5 }
 0x112   :  { %v686_v12 = vpop.permute.xlu0 %685  ;;  %v722_v61 = vadd.f32 %v706_v55, %v1696_v46  ;;  %v1794_v55 = vpop.eup %1298  ;;  %1322 = vtanh.bf16 %v736_v29 }
 0x113   :  { %v717_v40 = vadd.f32 %v686_v12, %v1730_v39  ;;  %2295 = vst [vmem:[#allocation16_spill] sm:$0xff] %v1794_v55  ;;  %v1800_v59 = vpop.eup %1300  ;;  %1324 = vtanh.bf16 %v731_v13  ;;  %v348_v13 = vrot.slane %v1620_v8, 4 }
 0x114   :  { %v738_v62 = vpack.c.bf16 %v722_v61, %v722_v61 }
 0x115   :  { %v914_v30 = vpop.permute.xlu1 %913  ;;  %v733_v49 = vpack.c.bf16 %v717_v40, %v717_v40  ;;  %v336_v40 = vrot.slane %v1616_v6, 4 }
 0x116   :  { %v694_v3 = vpop.permute.xlu0 %693  ;;  %v972_v0 = vadd.f32 %v914_v30, %v1780_v17  ;;  %v320_v30 = vrot.slane %v1761_v31, 2  ;;  %1326 = vtanh.bf16 %v738_v62 }
 0x117   :  { %v719_v18 = vadd.f32 %v694_v3, %v1730_v39  ;;  %v326_v3 = vrot.slane %v1770_v34, 2  ;;  %1328 = vtanh.bf16 %v733_v49 }
 0x118   :  { %v988_v2 = vpack.c.bf16 %v972_v0, %v972_v0 }
 0x119   :  { %v922_v24 = vpop.permute.xlu1 %921  ;;  %v735_v53 = vpack.c.bf16 %v719_v18, %v719_v18 }
 0x11a   :  { %v702_v4 = vpop.permute.xlu0 %701  ;;  %v974_v12 = vadd.f32 %v922_v24, %v1780_v17  ;;  %v1808_v24 = vpop.eup %1302  ;;  %1330 = vtanh.bf16 %v988_v2 }
 0x11b   :  { %v721_v27 = vadd.f32 %v702_v4, %v1730_v39  ;;  %v1812_v39 = vpop.eup %1304  ;;  %1332 = vtanh.bf16 %v735_v53  ;;  %v1835_v53 = vadd.f32 %v316_v45, %v1758_v11 }
 0x11c   :  { %v990_v4 = vpack.c.bf16 %v974_v12, %v974_v12  ;;  %v1816_v0 = vpop.eup %1306  ;;  %v354_v12 = vrot.slane %v1622_v9, 4 }
 0x11d   :  { %v930_v47 = vpop.permute.xlu1 %929  ;;  %v737_v5 = vpack.c.bf16 %v721_v27, %v721_v27  ;;  %v1820_v18 = vpop.eup %1308  ;;  %2296 = vst [vmem:[#allocation17_spill] sm:$0xff] %v1835_v53 }
 0x11e   :  { %v910_v46 = vpop.permute.xlu0 %909  ;;  %v976_v57 = vadd.f32 %v930_v47, %v1780_v17  ;;  %v342_v47 = vrot.slane %v1618_v7, 4  ;;  %1334 = vtanh.bf16 %v990_v4  ;;  %v332_v4 = vrot.slane %v1806_v52, 2 }
 0x11f   :  { %v971_v61 = vadd.f32 %v910_v46, %v1797_v1  ;;  %1336 = vtanh.bf16 %v737_v5 }
 0x120   :  { %v992_v23 = vpack.c.bf16 %v976_v57, %v976_v57  ;;  %v343_v2 = vadd.f32 %v342_v47, %v1618_v7 }
 0x121   :  { %v938_v19 = vpop.permute.xlu1 %937  ;;  %v987_v42 = vpack.c.bf16 %v971_v61, %v971_v61  ;;  %v349_v61 = vadd.f32 %v348_v13, %v1620_v8 }
 0x122   :  { %v918_v50 = vpop.permute.xlu0 %917  ;;  %v978_v29 = vadd.f32 %v938_v19, %v1780_v17  ;;  %v1824_v19 = vpop.eup %1310  ;;  %1338 = vtanh.bf16 %v992_v23  ;;  %v321_v23 = vadd.f32 %v320_v30, %v1761_v31 }
 0x123   :  { %v973_v16 = vadd.f32 %v918_v50, %v1797_v1  ;;  %v337_v50 = vadd.f32 %v336_v40, %v1616_v6  ;;  %v1828_v60 = vpop.eup %1312  ;;  %1340 = vtanh.bf16 %v987_v42  ;;  %v327_v42 = vadd.f32 %v326_v3, %v1770_v34 }
 0x124   :  { %v994_v36 = vpack.c.bf16 %v978_v29, %v978_v29  ;;  %v1832_v57 = vpop.eup %1314  ;;  %v355_v29 = vadd.f32 %v354_v12, %v1622_v9  ;;  %v322_v3 = vrot.slane %v321_v23, 1 }
 0x125   :  { %v946_v62 = vpop.permute.xlu1 %945  ;;  %v989_v22 = vpack.c.bf16 %v973_v16, %v973_v16  ;;  %v338_v11 = vrot.slane %v337_v50, 2  ;;  %v344_v16 = vrot.slane %v343_v2, 2 }
 0x126   :  { %v980_v49 = vadd.f32 %v946_v62, %v1780_v17  ;;  %v926_v27 = vpop.permute.xlu0 %925  ;;  %v1838_v62 = vpop.eup %1316  ;;  %1342 = vtanh.bf16 %v994_v36 }
 0x127   :  { %v975_v46 = vadd.f32 %v926_v27, %v1797_v1  ;;  %v1842_v27 = vpop.eup %1318  ;;  %1344 = vtanh.bf16 %v989_v22 }
 0x128   :  { %v996_v6 = vpack.c.bf16 %v980_v49, %v980_v49  ;;  %2297 = vst [vmem:[#allocation18_spill] sm:$0xff] %v1842_v27  ;;  %v1845_v45 = vpop.eup %1320 }
 0x129   :  { %v954_v40 = vpop.permute.xlu1 %953  ;;  %v991_v7 = vpack.c.bf16 %v975_v46, %v975_v46  ;;  %v1851_v13 = vpop.eup %1322  ;;  %v350_v46 = vrot.slane %v349_v61, 2 }
 0x12a   :  { %v982_v47 = vadd.f32 %v954_v40, %v1780_v17  ;;  %v934_v5 = vpop.permute.xlu0 %933  ;;  %2298 = vst [vmem:[#allocation19_spill] sm:$0xff] %v1851_v13  ;;  %v1856_v12 = vpop.eup %1324  ;;  %1346 = vtanh.bf16 %v996_v6  ;;  %v333_v40 = vadd.f32 %v332_v4, %v1806_v52  ;;  %v345_v6 = vadd.f32 %v344_v16, %v343_v2 }
 0x12b   :  { %v977_v8 = vadd.f32 %v934_v5, %v1797_v1  ;;  %v356_v5 = vrot.slane %v355_v29, 2  ;;  %v1859_v53 = vpop.eup %1326  ;;  %1348 = vtanh.bf16 %v991_v7  ;;  %v328_v4 = vrot.slane %v327_v42, 1 }
 0x12c   :  { %v998_v9 = vpack.c.bf16 %v982_v47, %v982_v47  ;;  %2299 = vst [vmem:[#allocation20_spill] sm:$0xff] %v1859_v53  ;;  %v339_v47 = vadd.f32 %v338_v11, %v337_v50  ;;  %v1863_v37 = vpop.eup %1328  ;;  %v351_v25 = vadd.f32 %v350_v46, %v349_v61  ;;  %v334_v50 = vrot.slane %v333_v40, 1 }
 0x12d   :  { %v993_v36 = vpack.c.bf16 %v977_v8, %v977_v8  ;;  %v962_v49 = vpop.permute.xlu1 %961  ;;  %v1866_v8 = vpop.eup %1330  ;;  %v357_v11 = vadd.f32 %v356_v5, %v355_v29  ;;  %v1878_v46 = vadd.f32 %v322_v3, %v321_v23  ;;  %v1883_v7 = vadd.f32 %v328_v4, %v327_v42 }
 0x12e   :  { %v984_v22 = vadd.f32 %v962_v49, %v1780_v17  ;;  %v942_v30 = vpop.permute.xlu0 %941  ;;  %1350 = vtanh.bf16 %v998_v9  ;;  %2300 = vst [vmem:[#allocation21_spill] sm:$0xff] %v1866_v8  ;;  %v1868_v38 = vpop.eup %1332  ;;  %v1888_v55 = vadd.f32 %v334_v50, %v333_v40 }
 0x12f   :  { %v979_v34 = vadd.f32 %v942_v30, %v1797_v1  ;;  %1352 = vtanh.bf16 %v993_v36  ;;  %2301 = vst [vmem:[#allocation22_spill] sm:$0xff] %v1868_v38  ;;  %v1871_v15 = vpop.eup %1334  ;;  %v340_v36 = vrot.slane %v339_v47, 1  ;;  %v346_v30 = vrot.slane %v345_v6, 1 }
 0x130   :  { %v1000_v52 = vpack.c.bf16 %v984_v22, %v984_v22  ;;  %2302 = vst [vmem:[#allocation23_spill] sm:$0xff] %v1871_v15  ;;  %v1875_v22 = vpop.eup %1336 }
 0x131   :  { %v995_v49 = vpack.c.bf16 %v979_v34, %v979_v34  ;;  %v970_v31 = vpop.permute.xlu1 %969  ;;  %2303 = vst [vmem:[#allocation24_spill] sm:$0xff] %v1875_v22  ;;  %v1880_v34 = vpop.eup %1338  ;;  %v1900_v40 = vadd.f32 %v346_v30, %v345_v6  ;;  %v2319_v30 = vunpack.c.l.bf16 %v1680_v28 }
 0x132   :  { %1354 = vtanh.bf16 %v1000_v52  ;;  %v986_v2 = vadd.f32 %v970_v31, %v1780_v17  ;;  %v950_v16 = vpop.permute.xlu0 %949  ;;  %2304 = vst [vmem:[#allocation25_spill] sm:$0xff] %v1880_v34  ;;  %v352_v52 = vrot.slane %v351_v25, 1  ;;  %v1885_v9 = vpop.eup %1340 }
 0x133   :  { %1356 = vtanh.bf16 %v995_v49  ;;  %v981_v61 = vadd.f32 %v950_v16, %v1797_v1  ;;  %2305 = vst [vmem:[#allocation26_spill] sm:$0xff] %v1885_v9  ;;  %v358_v49 = vrot.slane %v357_v11, 1  ;;  %v1890_v16 = vpop.eup %1342 }
 0x134   :  { %v1002_v5 = vpack.c.bf16 %v986_v2, %v986_v2  ;;  %2306 = vst [vmem:[#allocation27_spill] sm:$0xff] %v1890_v16  ;;  %v1894_v2 = vadd.f32 %v340_v36, %v339_v47  ;;  %v1896_v42 = vpop.eup %1344  ;;  %v1907_v3 = vadd.f32 %v352_v52, %v351_v25  ;;  %v2314_v25 = vunpack.c.l.bf16 %v1663_v58 }
 0x135   :  { %v997_v31 = vpack.c.bf16 %v981_v61, %v981_v61  ;;  %2307 = vst [vmem:[#allocation28_spill] sm:$0xff] %v1896_v42  ;;  %v1902_v50 = vpop.eup %1346  ;;  %v2315_v36 = vunpack.c.l.bf16 %v1670_v21  ;;  %v2321_v58 = vunpack.c.l.bf16 %v1738_v51  ;;  %v2322_v21 = vunpack.c.l.bf16 %v1686_v33 }
 0x136   :  { %1358 = vtanh.bf16 %v1002_v5  ;;  %v958_v29 = vpop.permute.xlu0 %957  ;;  %2308 = vst [vmem:[#allocation29_spill] sm:$0xff] %v1902_v50  ;;  %v1909_v47 = vpop.eup %1348  ;;  %v2316_v50 = vunpack.c.l.bf16 %v1703_v20  ;;  %v2323_v20 = vunpack.c.l.bf16 %v1772_v35  ;;  %v2327_v51 = vunpack.c.l.bf16 %v1732_v41 }
 0x137   :  { %1360 = vtanh.bf16 %v997_v31  ;;  %v983_v61 = vadd.f32 %v958_v29, %v1797_v1  ;;  %2309 = vst [vmem:[#allocation30_spill] sm:$0xff] %v1909_v47  ;;  %v1913_v29 = vadd.f32 %v358_v49, %v357_v11  ;;  %v2318_v49 = vunpack.c.l.bf16 %v1716_v63 }
 0x138   :  { %v2328_v35 = vunpack.c.l.bf16 %v1800_v59 }
 0x139   :  { %v999_v4 = vpack.c.bf16 %v983_v61, %v983_v61  ;;  %v1915_v6 = vpop.eup %1350 }
 0x13a   :  { %2310 = vst [vmem:[#allocation31_spill] sm:$0xff] %v1915_v6  ;;  %v966_v52 = vpop.permute.xlu0 %965  ;;  %v1921_v5 = vpop.eup %1352 }
 0x13b   :  { %2311 = vst [vmem:[#allocation32_spill] sm:$0xff] %v1921_v5  ;;  %1362 = vtanh.bf16 %v999_v4  ;;  %v985_v11 = vadd.f32 %v966_v52, %v1797_v1  ;;  %v2317_v1 = vunpack.c.l.bf16 %v1675_v26  ;;  %v2324_v26 = vunpack.c.l.bf16 %v1710_v56 }
 0x13d   :  { %v1930_v17 = vpop.eup %1354  ;;  %v1001_v31 = vpack.c.bf16 %v985_v11, %v985_v11 }
 0x13e   :  { %2312 = vst [vmem:[#allocation33_spill] sm:$0xff] %v1930_v17  ;;  %v1935_v4 = vpop.eup %1356  ;;  %v510_v23 = vpop.permute.xlu0 %509 }
 0x13f   :  { %2313 = vst [vmem:[#allocation34_spill] sm:$0xff] %v1935_v4  ;;  %1364 = vtanh.bf16 %v1001_v31  ;;  %v512_v53 = vmul.f32 %v510_v23, %v2314_v25  ;;  %v513_v11 = vmul.f32 %v510_v23, %v2315_v36  ;;  %v514_v16 = vmul.f32 %v510_v23, %v2316_v50 }
 0x140   :  { %v515_v52 = vmul.f32 %v510_v23, %v2317_v1  ;;  %v516_v6 = vmul.f32 %v510_v23, %v2318_v49  ;;  %v517_v17 = vmul.f32 %v510_v23, %v2319_v30  ;;  %v518_v31 = vmul.f32 %v510_v23, %v2321_v58 }
 0x141   :  { %v1954_v61 = vpop.eup %1358  ;;  %v519_v36 = vmul.f32 %v510_v23, %v2322_v21  ;;  %v1962_v50 = vmul.f32 %v510_v23, %v2323_v20  ;;  %v1966_v25 = vmul.f32 %v510_v23, %v2324_v26  ;;  %v2326_v30 = vunpack.c.l.bf16 %v1782_v14 }
 0x142   :  { %2320 = vst [vmem:[#allocation35_spill] sm:$0xff] %v1954_v61  ;;  %v1968_v63 = vpop.eup %1360  ;;  %v1977_v33 = vmul.f32 %v510_v23, %v2327_v51  ;;  %v1981_v1 = vmul.f32 %v510_v23, %v2328_v35  ;;  %v2329_v58 = vunpack.c.l.bf16 %v1763_v43  ;;  %v2330_v20 = vunpack.c.l.bf16 %v1812_v39 }
 0x143   :  { %2325 = vst [vmem:[#allocation36_spill] sm:$0xff] %v1968_v63  ;;  %v1973_v49 = vmul.f32 %v510_v23, %v2326_v30  ;;  %v2331_v14 = vunpack.c.l.bf16 %v1776_v44  ;;  %v528_v41 = vrot.slane %v512_v53, 4  ;;  %v534_v51 = vrot.slane %v513_v11, 4 }
 0x144   :  { %v1986_v21 = vmul.f32 %v510_v23, %v2329_v58  ;;  %v1990_v26 = vmul.f32 %v510_v23, %v2330_v20  ;;  %v540_v28 = vrot.slane %v514_v16, 4  ;;  %v546_v59 = vrot.slane %v515_v52, 4 }
 0x145   :  { %v1994_v30 = vmul.f32 %v510_v23, %v2331_v14  ;;  %v552_v35 = vrot.slane %v516_v6, 4  ;;  %v558_v61 = vrot.slane %v517_v17, 4  ;;  %v564_v4 = vrot.slane %v518_v31, 4 }
 0x146   :  { %v570_v56 = vrot.slane %v519_v36, 4  ;;  %v1996_v63 = vpop.eup %1362  ;;  %v529_v43 = vadd.f32 %v528_v41, %v512_v53  ;;  %v535_v58 = vadd.f32 %v534_v51, %v513_v11  ;;  %v541_v5 = vadd.f32 %v540_v28, %v514_v16 }
 0x147   :  { %2332 = vst [vmem:[#allocation37_spill] sm:$0xff] %v1996_v63  ;;  %v547_v39 = vadd.f32 %v546_v59, %v515_v52  ;;  %v553_v34 = vadd.f32 %v552_v35, %v516_v6  ;;  %v559_v44 = vadd.f32 %v558_v61, %v517_v17  ;;  %v565_v23 = vadd.f32 %v564_v4, %v518_v31 }
 0x148   :  { %v530_v14 = vrot.slane %v529_v43, 2  ;;  %v536_v47 = vrot.slane %v535_v58, 2  ;;  %v542_v15 = vrot.slane %v541_v5, 2  ;;  %v571_v13 = vadd.f32 %v570_v56, %v519_v36 }
 0x149   :  { %v548_v42 = vrot.slane %v547_v39, 2  ;;  %v554_v8 = vrot.slane %v553_v34, 2  ;;  %v560_v9 = vrot.slane %v559_v44, 2  ;;  %v566_v22 = vrot.slane %v565_v23, 2 }
 0x14a   :  { %v1999_v38 = vpop.eup %1364  ;;  %v531_v27 = vadd.f32 %v530_v14, %v529_v43  ;;  %v537_v53 = vadd.f32 %v536_v47, %v535_v58  ;;  %v543_v11 = vadd.f32 %v542_v15, %v541_v5  ;;  %v572_v20 = vrot.slane %v571_v13, 2 }
 0x14b   :  { %2333 = vst [vmem:[#allocation38_spill] sm:$0xff] %v1999_v38  ;;  %v549_v16 = vadd.f32 %v548_v42, %v547_v39  ;;  %v555_v28 = vadd.f32 %v554_v8, %v553_v34  ;;  %v561_v6 = vadd.f32 %v560_v9, %v559_v44  ;;  %v567_v17 = vadd.f32 %v566_v22, %v565_v23 }
 0x14c   :  { %v532_v61 = vrot.slane %v531_v27, 1  ;;  %v538_v4 = vrot.slane %v537_v53, 1  ;;  %v544_v31 = vrot.slane %v543_v11, 1  ;;  %v573_v5 = vadd.f32 %v572_v20, %v571_v13 }
 0x14d   :  { %v550_v41 = vrot.slane %v549_v16, 1  ;;  %v556_v51 = vrot.slane %v555_v28, 1  ;;  %v562_v59 = vrot.slane %v561_v6, 1  ;;  %v568_v35 = vrot.slane %v567_v17, 1 }
 0x14e   :  { %v533_v36 = vadd.f32 %v532_v61, %v531_v27  ;;  %v539_v56 = vadd.f32 %v538_v4, %v537_v53  ;;  %v545_v63 = vadd.f32 %v544_v31, %v543_v11  ;;  %v576_v8 = vrot.slane %v1962_v50, 4 }
 0x14f   :  { %v551_v43 = vadd.f32 %v550_v41, %v549_v16  ;;  %v557_v47 = vadd.f32 %v556_v51, %v555_v28  ;;  %v563_v15 = vadd.f32 %v562_v59, %v561_v6  ;;  %v569_v42 = vadd.f32 %v568_v35, %v567_v17 }
 0x150   :  { %v582_v9 = vrot.slane %v1966_v25, 4  ;;  %v588_v22 = vrot.slane %v1973_v49, 4  ;;  %v594_v34 = vrot.slane %v1977_v33, 4  ;;  %v574_v58 = vrot.slane %v573_v5, 1 }
 0x151   :  { %v600_v39 = vrot.slane %v1981_v1, 4  ;;  %v606_v27 = vrot.slane %v1986_v21, 4  ;;  %v612_v44 = vrot.slane %v1990_v26, 4  ;;  %v577_v23 = vadd.f32 %v576_v8, %v1962_v50 }
 0x152   :  { %v583_v14 = vadd.f32 %v582_v9, %v1966_v25  ;;  %v589_v13 = vadd.f32 %v588_v22, %v1973_v49  ;;  %v595_v20 = vadd.f32 %v594_v34, %v1977_v33  ;;  %v575_v53 = vadd.f32 %v574_v58, %v573_v5 }
 0x153   :  { %v601_v11 = vadd.f32 %v600_v39, %v1981_v1  ;;  %v607_v16 = vadd.f32 %v606_v27, %v1986_v21  ;;  %v613_v28 = vadd.f32 %v612_v44, %v1990_v26  ;;  %v578_v6 = vrot.slane %v577_v23, 2 }
 0x154   :  { %v584_v17 = vrot.slane %v583_v14, 2  ;;  %v590_v61 = vrot.slane %v589_v13, 2  ;;  %v596_v4 = vrot.slane %v595_v20, 2  ;;  %v618_v25 = vrot.slane %v1994_v30, 4 }
 0x155   :  { %v602_v31 = vrot.slane %v601_v11, 2  ;;  %v608_v41 = vrot.slane %v607_v16, 2  ;;  %v614_v50 = vrot.slane %v613_v28, 2  ;;  %v579_v51 = vadd.f32 %v578_v6, %v577_v23 }
 0x156   :  { %v585_v49 = vadd.f32 %v584_v17, %v583_v14  ;;  %v591_v59 = vadd.f32 %v590_v61, %v589_v13  ;;  %v597_v33 = vadd.f32 %v596_v4, %v595_v20  ;;  %v619_v21 = vadd.f32 %v618_v25, %v1994_v30  ;;  %v774_v17 = vpop.permute.xlu1 %773  ;;  %v2334_v4 = vld [vmem:[#allocation12_spill] sm:$0xff]  ;;  %v2336_v25 = vld [vmem:[#allocation14_spill] sm:$0xff] }
 0x157   :  { %v603_v35 = vadd.f32 %v602_v31, %v601_v11  ;;  %v609_v5 = vadd.f32 %v608_v41, %v607_v16  ;;  %v615_v1 = vadd.f32 %v614_v50, %v613_v28  ;;  %v580_v8 = vrot.slane %v579_v51, 1  ;;  %v2335_v41 = vld [vmem:[#allocation13_spill] sm:$0xff] }
 0x158   :  { %v586_v26 = vrot.slane %v585_v49, 1  ;;  %v592_v9 = vrot.slane %v591_v59, 1  ;;  %v598_v22 = vrot.slane %v597_v33, 1  ;;  %v620_v27 = vrot.slane %v619_v21, 2 }
 0x159   :  { %v604_v34 = vrot.slane %v603_v35, 1  ;;  %v610_v58 = vrot.slane %v609_v5, 1  ;;  %v616_v39 = vrot.slane %v615_v1, 1  ;;  %v581_v44 = vadd.f32 %v580_v8, %v579_v51 }
 0x15a   :  { %v587_v52 = vadd.f32 %v586_v26, %v585_v49  ;;  %v593_v38 = vadd.f32 %v592_v9, %v591_v59  ;;  %v599_v23 = vadd.f32 %v598_v22, %v597_v33  ;;  %v621_v11 = vadd.f32 %v620_v27, %v619_v21 }
 0x15b   :  { %v605_v14 = vadd.f32 %v604_v34, %v603_v35  ;;  %v611_v13 = vadd.f32 %v610_v58, %v609_v5  ;;  %v617_v20 = vadd.f32 %v616_v39, %v615_v1  ;;  %v2019_v16 = vadd.f32 %v533_v36, %v1700_v48  ;;  %v2337_v36 = vld [vmem:[#allocation15_spill] sm:$0xff]  ;;  %v2353_v58 = vld [vmem:[#allocation22_spill] sm:$0xff] }
 0x15c   :  { %v2022_v30 = vadd.f32 %v539_v56, %v1707_v54  ;;  %v2025_v28 = vadd.f32 %v545_v63, %v1713_v10  ;;  %v2028_v6 = vadd.f32 %v551_v43, %v1724_v32  ;;  %v622_v61 = vrot.slane %v621_v11, 1  ;;  %v2338_v56 = vld [vmem:[#allocation17_spill] sm:$0xff] }
 0x15d   :  { %v2031_v31 = vadd.f32 %v557_v47, %v2334_v4  ;;  %v2034_v50 = vadd.f32 %v563_v15, %v2335_v41  ;;  %v2037_v48 = vadd.f32 %v569_v42, %v2336_v25  ;;  %v2040_v54 = vadd.f32 %v575_v53, %v2337_v36 }
 0x15e   :  { %v2043_v10 = vadd.f32 %v581_v44, %v2338_v56  ;;  %v2046_v32 = vadd.f32 %v587_v52, %v1878_v46  ;;  %v2049_v63 = vadd.f32 %v593_v38, %v1883_v7  ;;  %v623_v43 = vadd.f32 %v622_v61, %v621_v11  ;;  %v2340_v52 = vld [vmem:[#allocation16_spill] sm:$0xff] }
 0x15f   :  { %v2052_v47 = vadd.f32 %v599_v23, %v1888_v55  ;;  %v2055_v15 = vadd.f32 %v605_v14, %v1894_v2  ;;  %v2058_v42 = vadd.f32 %v611_v13, %v1900_v40  ;;  %v2061_v53 = vadd.f32 %v617_v20, %v1907_v3  ;;  %v2359_v14 = vld [vmem:[#allocation20_spill] sm:$0xff] }
 0x160   :  { %v2339_v51 = vunpack.c.l.bf16 %v1820_v18  ;;  %v2341_v49 = vunpack.c.l.bf16 %v2340_v52  ;;  %v2342_v7 = vunpack.c.l.bf16 %v1828_v60  ;;  %v2070_v55 = vadd.f32 %v623_v43, %v1913_v29 }
 0x161   :  { %v2343_v2 = vunpack.c.l.bf16 %v1808_v24  ;;  %v2344_v40 = vunpack.c.l.bf16 %v1838_v62  ;;  %v2345_v3 = vunpack.c.l.bf16 %v1816_v0  ;;  %v2346_v18 = vunpack.c.l.bf16 %v1845_v45  ;;  %v2351_v62 = vld [vmem:[#allocation18_spill] sm:$0xff] }
 0x162   :  { %v776_v46 = vmul.f32 %v774_v17, %v2339_v51  ;;  %v777_v38 = vmul.f32 %v774_v17, %v2341_v49  ;;  %v778_v59 = vmul.f32 %v774_v17, %v2342_v7  ;;  %v2347_v21 = vunpack.c.l.bf16 %v1824_v19  ;;  %v2355_v19 = vld [vmem:[#allocation19_spill] sm:$0xff] }
 0x163   :  { %v779_v33 = vmul.f32 %v774_v17, %v2343_v2  ;;  %v780_v35 = vmul.f32 %v774_v17, %v2344_v40  ;;  %v781_v5 = vmul.f32 %v774_v17, %v2345_v3  ;;  %v782_v1 = vmul.f32 %v774_v17, %v2346_v18 }
 0x164   :  { %v783_v8 = vmul.f32 %v774_v17, %v2347_v21  ;;  %v2348_v60 = vunpack.c.l.bf16 %v1856_v12  ;;  %v2349_v29 = vunpack.c.l.bf16 %v1832_v57  ;;  %v2350_v24 = vunpack.c.l.bf16 %v1863_v37  ;;  %v2357_v12 = vld [vmem:[#allocation24_spill] sm:$0xff] }
 0x165   :  { %v2352_v34 = vunpack.c.l.bf16 %v2351_v62  ;;  %v2354_v45 = vunpack.c.l.bf16 %v2353_v58  ;;  %v2356_v27 = vunpack.c.l.bf16 %v2355_v19  ;;  %v2358_v23 = vunpack.c.l.bf16 %v2357_v12 }
 0x166   :  { %v784_v26 = vmul.f32 %v774_v17, %v2348_v60  ;;  %v785_v9 = vmul.f32 %v774_v17, %v2349_v29  ;;  %v2088_v22 = vmul.f32 %v774_v17, %v2350_v24  ;;  %v2360_v37 = vunpack.c.l.bf16 %v2359_v14 }
 0x167   :  { %v2092_v0 = vmul.f32 %v774_v17, %v2352_v34  ;;  %v2096_v39 = vmul.f32 %v774_v17, %v2354_v45  ;;  %v2100_v44 = vmul.f32 %v774_v17, %v2356_v27  ;;  %v2104_v57 = vmul.f32 %v774_v17, %v2358_v23 }
 0x168   :  { %v2108_v13 = vmul.f32 %v774_v17, %v2360_v37  ;;  %v792_v20 = vrot.slane %v776_v46, 4  ;;  %v798_v11 = vrot.slane %v777_v38, 4  ;;  %v804_v61 = vrot.slane %v778_v59, 4 }
 0x169   :  { %v810_v4 = vrot.slane %v779_v33, 4  ;;  %v816_v41 = vrot.slane %v780_v35, 4  ;;  %v822_v25 = vrot.slane %v781_v5, 4  ;;  %v828_v43 = vrot.slane %v782_v1, 4 }
 0x16a   :  { %v793_v36 = vadd.f32 %v792_v20, %v776_v46  ;;  %v799_v56 = vadd.f32 %v798_v11, %v777_v38  ;;  %v834_v51 = vrot.slane %v783_v8, 4  ;;  %v805_v52 = vadd.f32 %v804_v61, %v778_v59 }
 0x16b   :  { %v811_v49 = vadd.f32 %v810_v4, %v779_v33  ;;  %v817_v7 = vadd.f32 %v816_v41, %v780_v35  ;;  %v823_v2 = vadd.f32 %v822_v25, %v781_v5  ;;  %v829_v18 = vadd.f32 %v828_v43, %v782_v1 }
 0x16c   :  { %v794_v40 = vrot.slane %v793_v36, 2  ;;  %v800_v3 = vrot.slane %v799_v56, 2  ;;  %v835_v21 = vadd.f32 %v834_v51, %v783_v8  ;;  %v806_v17 = vrot.slane %v805_v52, 2 }
 0x16d   :  { %v812_v60 = vrot.slane %v811_v49, 2  ;;  %v818_v29 = vrot.slane %v817_v7, 2  ;;  %v824_v24 = vrot.slane %v823_v2, 2  ;;  %v830_v58 = vrot.slane %v829_v18, 2 }
 0x16e   :  { %v795_v62 = vadd.f32 %v794_v40, %v793_v36  ;;  %v801_v34 = vadd.f32 %v800_v3, %v799_v56  ;;  %v836_v45 = vrot.slane %v835_v21, 2  ;;  %v807_v46 = vadd.f32 %v806_v17, %v805_v52 }
 0x16f   :  { %v813_v38 = vadd.f32 %v812_v60, %v811_v49  ;;  %v819_v19 = vadd.f32 %v818_v29, %v817_v7  ;;  %v825_v27 = vadd.f32 %v824_v24, %v823_v2  ;;  %v831_v35 = vadd.f32 %v830_v58, %v829_v18 }
 0x170   :  { %v796_v59 = vrot.slane %v795_v62, 1  ;;  %v802_v33 = vrot.slane %v801_v34, 1  ;;  %v837_v5 = vadd.f32 %v836_v45, %v835_v21  ;;  %v808_v12 = vrot.slane %v807_v46, 1 }
 0x171   :  { %v814_v23 = vrot.slane %v813_v38, 1  ;;  %v820_v1 = vrot.slane %v819_v19, 1  ;;  %v826_v8 = vrot.slane %v825_v27, 1  ;;  %v832_v20 = vrot.slane %v831_v35, 1 }
 0x172   :  { %v797_v14 = vadd.f32 %v796_v59, %v795_v62  ;;  %v803_v37 = vadd.f32 %v802_v33, %v801_v34  ;;  %v838_v11 = vrot.slane %v837_v5, 1  ;;  %v809_v61 = vadd.f32 %v808_v12, %v807_v46 }
 0x173   :  { %v815_v4 = vadd.f32 %v814_v23, %v813_v38  ;;  %v821_v41 = vadd.f32 %v820_v1, %v819_v19  ;;  %v827_v25 = vadd.f32 %v826_v8, %v825_v27  ;;  %v833_v36 = vadd.f32 %v832_v20, %v831_v35 }
 0x174   :  { %v839_v56 = vadd.f32 %v838_v11, %v837_v5  ;;  %v840_v43 = vrot.slane %v784_v26, 4  ;;  %v846_v51 = vrot.slane %v785_v9, 4  ;;  %v852_v52 = vrot.slane %v2088_v22, 4 }
 0x175   :  { %v858_v49 = vrot.slane %v2092_v0, 4  ;;  %v864_v7 = vrot.slane %v2096_v39, 4  ;;  %v870_v2 = vrot.slane %v2100_v44, 4  ;;  %v876_v18 = vrot.slane %v2104_v57, 4 }
 0x176   :  { %v841_v40 = vadd.f32 %v840_v43, %v784_v26  ;;  %v847_v3 = vadd.f32 %v846_v51, %v785_v9  ;;  %v882_v21 = vrot.slane %v2108_v13, 4  ;;  %v853_v17 = vadd.f32 %v852_v52, %v2088_v22 }
 0x177   :  { %v859_v60 = vadd.f32 %v858_v49, %v2092_v0  ;;  %v865_v29 = vadd.f32 %v864_v7, %v2096_v39  ;;  %v871_v24 = vadd.f32 %v870_v2, %v2100_v44  ;;  %v877_v58 = vadd.f32 %v876_v18, %v2104_v57 }
 0x178   :  { %v842_v62 = vrot.slane %v841_v40, 2  ;;  %v848_v34 = vrot.slane %v847_v3, 2  ;;  %v883_v45 = vadd.f32 %v882_v21, %v2108_v13  ;;  %v854_v26 = vrot.slane %v853_v17, 2 }
 0x179   :  { %v860_v9 = vrot.slane %v859_v60, 2  ;;  %v866_v46 = vrot.slane %v865_v29, 2  ;;  %v872_v38 = vrot.slane %v871_v24, 2  ;;  %v878_v59 = vrot.slane %v877_v58, 2 }
 0x17a   :  { %v843_v19 = vadd.f32 %v842_v62, %v841_v40  ;;  %v849_v27 = vadd.f32 %v848_v34, %v847_v3  ;;  %v884_v22 = vrot.slane %v883_v45, 2  ;;  %v855_v33 = vadd.f32 %v854_v26, %v853_v17  ;;  %v1038_v17 = vpop.permute.xlu0 %1037 }
 0x17b   :  { %v861_v0 = vadd.f32 %v860_v9, %v859_v60  ;;  %v867_v35 = vadd.f32 %v866_v46, %v865_v29  ;;  %v873_v39 = vadd.f32 %v872_v38, %v871_v24  ;;  %v879_v12 = vadd.f32 %v878_v59, %v877_v58 }
 0x17c   :  { %v844_v5 = vrot.slane %v843_v19, 1  ;;  %v850_v44 = vrot.slane %v849_v27, 1  ;;  %v885_v23 = vadd.f32 %v884_v22, %v883_v45  ;;  %v856_v1 = vrot.slane %v855_v33, 1  ;;  %v2377_v22 = vld [vmem:[#allocation34_spill] sm:$0xff] }
 0x17d   :  { %v862_v57 = vrot.slane %v861_v0, 1  ;;  %v868_v8 = vrot.slane %v867_v35, 1  ;;  %v874_v13 = vrot.slane %v873_v39, 1  ;;  %v880_v43 = vrot.slane %v879_v12, 1 }
 0x17e   :  { %v845_v20 = vadd.f32 %v844_v5, %v843_v19  ;;  %v851_v11 = vadd.f32 %v850_v44, %v849_v27  ;;  %v886_v51 = vrot.slane %v885_v23, 1  ;;  %v857_v52 = vadd.f32 %v856_v1, %v855_v33  ;;  %v2375_v19 = vld [vmem:[#allocation27_spill] sm:$0xff]  ;;  %v2381_v44 = vld [vmem:[#allocation36_spill] sm:$0xff] }
 0x17f   :  { %v863_v49 = vadd.f32 %v862_v57, %v861_v0  ;;  %v869_v7 = vadd.f32 %v868_v8, %v867_v35  ;;  %v875_v2 = vadd.f32 %v874_v13, %v873_v39  ;;  %v881_v40 = vadd.f32 %v880_v43, %v879_v12  ;;  %v2379_v35 = vld [vmem:[#allocation29_spill] sm:$0xff]  ;;  %v2383_v1 = vld [vmem:[#allocation31_spill] sm:$0xff] }
 0x180   :  { %v887_v3 = vadd.f32 %v886_v51, %v885_v23  ;;  %v2123_v18 = vadd.f32 %v797_v14, %v2019_v16  ;;  %v2126_v21 = vadd.f32 %v803_v37, %v2022_v30  ;;  %v2129_v60 = vadd.f32 %v809_v61, %v2025_v28  ;;  %v2385_v13 = vld [vmem:[#allocation37_spill] sm:$0xff] }
 0x181   :  { %v2132_v29 = vadd.f32 %v815_v4, %v2028_v6  ;;  %v2135_v24 = vadd.f32 %v821_v41, %v2031_v31  ;;  %v2138_v62 = vadd.f32 %v827_v25, %v2034_v50  ;;  %v2141_v34 = vadd.f32 %v833_v36, %v2037_v48  ;;  %v2387_v43 = vld [vmem:[#allocation33_spill] sm:$0xff] }
 0x182   :  { %v2144_v16 = vadd.f32 %v839_v56, %v2040_v54  ;;  %v2147_v30 = vadd.f32 %v845_v20, %v2043_v10  ;;  %v2150_v28 = vadd.f32 %v851_v11, %v2046_v32  ;;  %v2153_v6 = vadd.f32 %v857_v52, %v2049_v63  ;;  %v2361_v32 = vld [vmem:[#allocation26_spill] sm:$0xff]  ;;  %v2363_v63 = vld [vmem:[#allocation21_spill] sm:$0xff] }
 0x183   :  { %v2156_v31 = vadd.f32 %v863_v49, %v2052_v47  ;;  %v2159_v50 = vadd.f32 %v869_v7, %v2055_v15  ;;  %v2162_v48 = vadd.f32 %v875_v2, %v2058_v42  ;;  %v2165_v54 = vadd.f32 %v881_v40, %v2061_v53  ;;  %v2365_v47 = vld [vmem:[#allocation28_spill] sm:$0xff]  ;;  %v2367_v15 = vld [vmem:[#allocation23_spill] sm:$0xff]  ;;  %v2369_v42 = vld [vmem:[#allocation30_spill] sm:$0xff] }
 0x184   :  { %v2168_v10 = vadd.f32 %v887_v3, %v2070_v55  ;;  %v2362_v14 = vunpack.c.l.bf16 %v2361_v32  ;;  %v2364_v61 = vunpack.c.l.bf16 %v2363_v63  ;;  %v2366_v41 = vunpack.c.l.bf16 %v2365_v47  ;;  %v2371_v53 = vld [vmem:[#allocation25_spill] sm:$0xff]  ;;  %v2373_v55 = vld [vmem:[#allocation32_spill] sm:$0xff]  ;;  %v2389_v49 = vld [vmem:[#allocation38_spill] sm:$0xff] }
 0x185   :  { %v2368_v36 = vunpack.c.l.bf16 %v2367_v15  ;;  %v2370_v58 = vunpack.c.l.bf16 %v2369_v42  ;;  %v2372_v26 = vunpack.c.l.bf16 %v2371_v53  ;;  %v2374_v46 = vunpack.c.l.bf16 %v2373_v55  ;;  %v2391_v40 = vld [vmem:[#allocation35_spill] sm:$0xff] }
 0x186   :  { %v1040_v37 = vmul.f32 %v1038_v17, %v2362_v14  ;;  %v1041_v4 = vmul.f32 %v1038_v17, %v2364_v61  ;;  %v1042_v25 = vmul.f32 %v1038_v17, %v2366_v41  ;;  %v2376_v27 = vunpack.c.l.bf16 %v2375_v19 }
 0x187   :  { %v1043_v56 = vmul.f32 %v1038_v17, %v2368_v36  ;;  %v1044_v45 = vmul.f32 %v1038_v17, %v2370_v58  ;;  %v1045_v9 = vmul.f32 %v1038_v17, %v2372_v26  ;;  %v1046_v38 = vmul.f32 %v1038_v17, %v2374_v46 }
 0x188   :  { %v1047_v59 = vmul.f32 %v1038_v17, %v2376_v27  ;;  %v2378_v33 = vunpack.c.l.bf16 %v2377_v22  ;;  %v2380_v39 = vunpack.c.l.bf16 %v2379_v35  ;;  %v2382_v12 = vunpack.c.l.bf16 %v2381_v44 }
 0x189   :  { %v2384_v57 = vunpack.c.l.bf16 %v2383_v1  ;;  %v2386_v20 = vunpack.c.l.bf16 %v2385_v13  ;;  %v2388_v51 = vunpack.c.l.bf16 %v2387_v43  ;;  %v2390_v7 = vunpack.c.l.bf16 %v2389_v49 }
 0x18a   :  { %v1048_v0 = vmul.f32 %v1038_v17, %v2378_v33  ;;  %v1049_v5 = vmul.f32 %v1038_v17, %v2380_v39  ;;  %v2192_v23 = vmul.f32 %v1038_v17, %v2382_v12  ;;  %v2392_v3 = vunpack.c.l.bf16 %v2391_v40 }
 0x18b   :  { %v2196_v8 = vmul.f32 %v1038_v17, %v2384_v57  ;;  %v2200_v11 = vmul.f32 %v1038_v17, %v2386_v20  ;;  %v2204_v52 = vmul.f32 %v1038_v17, %v2388_v51  ;;  %v2208_v2 = vmul.f32 %v1038_v17, %v2390_v7 }
 0x18c   :  { %v2212_v32 = vmul.f32 %v1038_v17, %v2392_v3  ;;  %v1056_v14 = vrot.slane %v1040_v37, 4  ;;  %v1062_v63 = vrot.slane %v1041_v4, 4  ;;  %v1068_v61 = vrot.slane %v1042_v25, 4 }
 0x18d   :  { %v1074_v47 = vrot.slane %v1043_v56, 4  ;;  %v1080_v41 = vrot.slane %v1044_v45, 4  ;;  %v1086_v15 = vrot.slane %v1045_v9, 4  ;;  %v1092_v58 = vrot.slane %v1046_v38, 4 }
 0x18e   :  { %v1057_v36 = vadd.f32 %v1056_v14, %v1040_v37  ;;  %v1063_v42 = vadd.f32 %v1062_v63, %v1041_v4  ;;  %v1098_v53 = vrot.slane %v1047_v59, 4  ;;  %v1069_v26 = vadd.f32 %v1068_v61, %v1042_v25 }
 0x18f   :  { %v1075_v55 = vadd.f32 %v1074_v47, %v1043_v56  ;;  %v1081_v46 = vadd.f32 %v1080_v41, %v1044_v45  ;;  %v1087_v19 = vadd.f32 %v1086_v15, %v1045_v9  ;;  %v1093_v33 = vadd.f32 %v1092_v58, %v1046_v38 }
 0x190   :  { %v1058_v27 = vrot.slane %v1057_v36, 2  ;;  %v1064_v22 = vrot.slane %v1063_v42, 2  ;;  %v1099_v35 = vadd.f32 %v1098_v53, %v1047_v59  ;;  %v1070_v17 = vrot.slane %v1069_v26, 2 }
 0x191   :  { %v1076_v39 = vrot.slane %v1075_v55, 2  ;;  %v1082_v44 = vrot.slane %v1081_v46, 2  ;;  %v1088_v12 = vrot.slane %v1087_v19, 2  ;;  %v1094_v13 = vrot.slane %v1093_v33, 2 }
 0x192   :  { %v1059_v1 = vadd.f32 %v1058_v27, %v1057_v36  ;;  %v1065_v57 = vadd.f32 %v1064_v22, %v1063_v42  ;;  %v1100_v20 = vrot.slane %v1099_v35, 2  ;;  %v1071_v37 = vadd.f32 %v1070_v17, %v1069_v26 }
 0x193   :  { %v1077_v4 = vadd.f32 %v1076_v39, %v1075_v55  ;;  %v1083_v43 = vadd.f32 %v1082_v44, %v1081_v46  ;;  %v1089_v51 = vadd.f32 %v1088_v12, %v1087_v19  ;;  %v1095_v45 = vadd.f32 %v1094_v13, %v1093_v33 }
 0x194   :  { %v1060_v25 = vrot.slane %v1059_v1, 1  ;;  %v1066_v56 = vrot.slane %v1065_v57, 1  ;;  %v1101_v9 = vadd.f32 %v1100_v20, %v1099_v35  ;;  %v1072_v49 = vrot.slane %v1071_v37, 1 }
 0x195   :  { %v1078_v7 = vrot.slane %v1077_v4, 1  ;;  %v1084_v38 = vrot.slane %v1083_v43, 1  ;;  %v1090_v59 = vrot.slane %v1089_v51, 1  ;;  %v1096_v14 = vrot.slane %v1095_v45, 1 }
 0x196   :  { %v1061_v40 = vadd.f32 %v1060_v25, %v1059_v1  ;;  %v1067_v3 = vadd.f32 %v1066_v56, %v1065_v57  ;;  %v1102_v63 = vrot.slane %v1101_v9, 1  ;;  %v1073_v61 = vadd.f32 %v1072_v49, %v1071_v37 }
 0x197   :  { %v1079_v47 = vadd.f32 %v1078_v7, %v1077_v4  ;;  %v1085_v41 = vadd.f32 %v1084_v38, %v1083_v43  ;;  %v1091_v15 = vadd.f32 %v1090_v59, %v1089_v51  ;;  %v1097_v36 = vadd.f32 %v1096_v14, %v1095_v45 }
 0x198   :  { %v1103_v42 = vadd.f32 %v1102_v63, %v1101_v9  ;;  %v1104_v58 = vrot.slane %v1048_v0, 4  ;;  %v1110_v53 = vrot.slane %v1049_v5, 4  ;;  %v1116_v26 = vrot.slane %v2192_v23, 4 }
 0x199   :  { %v1122_v55 = vrot.slane %v2196_v8, 4  ;;  %v1128_v46 = vrot.slane %v2200_v11, 4  ;;  %v1134_v19 = vrot.slane %v2204_v52, 4  ;;  %v1140_v33 = vrot.slane %v2208_v2, 4 }
 0x19a   :  { %v1105_v27 = vadd.f32 %v1104_v58, %v1048_v0  ;;  %v1111_v22 = vadd.f32 %v1110_v53, %v1049_v5  ;;  %v1146_v35 = vrot.slane %v2212_v32, 4  ;;  %v1117_v17 = vadd.f32 %v1116_v26, %v2192_v23 }
 0x19b   :  { %v1123_v39 = vadd.f32 %v1122_v55, %v2196_v8  ;;  %v1129_v44 = vadd.f32 %v1128_v46, %v2200_v11  ;;  %v1135_v12 = vadd.f32 %v1134_v19, %v2204_v52  ;;  %v1141_v13 = vadd.f32 %v1140_v33, %v2208_v2 }
 0x19c   :  { %v1106_v1 = vrot.slane %v1105_v27, 2  ;;  %v1112_v57 = vrot.slane %v1111_v22, 2  ;;  %v1147_v20 = vadd.f32 %v1146_v35, %v2212_v32  ;;  %v1118_v0 = vrot.slane %v1117_v17, 2 }
 0x19d   :  { %v1124_v5 = vrot.slane %v1123_v39, 2  ;;  %v1130_v37 = vrot.slane %v1129_v44, 2  ;;  %v1136_v4 = vrot.slane %v1135_v12, 2  ;;  %v1142_v23 = vrot.slane %v1141_v13, 2 }
 0x19e   :  { %v1107_v43 = vadd.f32 %v1106_v1, %v1105_v27  ;;  %v1113_v51 = vadd.f32 %v1112_v57, %v1111_v22  ;;  %v1148_v25 = vrot.slane %v1147_v20, 2  ;;  %v1119_v8 = vadd.f32 %v1118_v0, %v1117_v17 }
 0x19f   :  { %v1125_v56 = vadd.f32 %v1124_v5, %v1123_v39  ;;  %v1131_v11 = vadd.f32 %v1130_v37, %v1129_v44  ;;  %v1137_v45 = vadd.f32 %v1136_v4, %v1135_v12  ;;  %v1143_v49 = vadd.f32 %v1142_v23, %v1141_v13 }
 0x1a0   :  { %v1108_v52 = vrot.slane %v1107_v43, 1  ;;  %v1114_v9 = vrot.slane %v1113_v51, 1  ;;  %v1149_v7 = vadd.f32 %v1148_v25, %v1147_v20  ;;  %v1120_v2 = vrot.slane %v1119_v8, 1 }
 0x1a1   :  { %v1126_v38 = vrot.slane %v1125_v56, 1  ;;  %v1132_v32 = vrot.slane %v1131_v11, 1  ;;  %v1138_v59 = vrot.slane %v1137_v45, 1  ;;  %v1144_v58 = vrot.slane %v1143_v49, 1 }
 0x1a2   :  { %v1109_v14 = vadd.f32 %v1108_v52, %v1107_v43  ;;  %v1115_v63 = vadd.f32 %v1114_v9, %v1113_v51  ;;  %v1150_v53 = vrot.slane %v1149_v7, 1  ;;  %v1121_v26 = vadd.f32 %v1120_v2, %v1119_v8 }
 0x1a3   :  { %v1127_v55 = vadd.f32 %v1126_v38, %v1125_v56  ;;  %v1133_v46 = vadd.f32 %v1132_v32, %v1131_v11  ;;  %v1139_v19 = vadd.f32 %v1138_v59, %v1137_v45  ;;  %v1145_v27 = vadd.f32 %v1144_v58, %v1143_v49 }
 0x1a4   :  { %v1151_v22 = vadd.f32 %v1150_v53, %v1149_v7  ;;  %v1152_v33 = vadd.f32 %v1061_v40, %v2123_v18  ;;  %v1153_v35 = vadd.f32 %v1067_v3, %v2126_v21  ;;  %v1154_v17 = vadd.f32 %v1073_v61, %v2129_v60 }
 0x1a5   :  { %v1155_v39 = vadd.f32 %v1079_v47, %v2132_v29  ;;  %v1156_v44 = vadd.f32 %v1085_v41, %v2135_v24  ;;  %v1157_v12 = vadd.f32 %v1091_v15, %v2138_v62  ;;  %v1158_v1 = vadd.f32 %v1097_v36, %v2141_v34 }
 0x1a6   :  { %v1159_v57 = vadd.f32 %v1103_v42, %v2144_v16  ;;  %v1160_v13 = vadd.f32 %v1109_v14, %v2147_v30  ;;  %v1161_v20 = vadd.f32 %v1115_v63, %v2150_v28  ;;  %v1162_v18 = vadd.f32 %v1121_v26, %v2153_v6 }
 0x1a7   :  { %v1163_v21 = vadd.f32 %v1127_v55, %v2156_v31  ;;  %v1164_v60 = vadd.f32 %v1133_v46, %v2159_v50  ;;  %v1165_v29 = vadd.f32 %v1139_v19, %v2162_v48  ;;  %v1166_v24 = vadd.f32 %v1145_v27, %v2165_v54 }
 0x1a8   :  { %v1167_v62 = vadd.f32 %v1151_v22, %v2168_v10  ;;  %v1185_v34 = vsel %vm1184_vm0, %v1153_v35, %v1152_v33  ;;  %v1186_v16 = vsel %vm1184_vm0, %v1155_v39, %v1154_v17  ;;  %v1187_v30 = vsel %vm1184_vm0, %v1157_v12, %v1156_v44 }
 0x1a9   :  { %v1188_v28 = vsel %vm1184_vm0, %v1159_v57, %v1158_v1  ;;  %v1189_v6 = vsel %vm1184_vm0, %v1161_v20, %v1160_v13  ;;  %v1190_v31 = vsel %vm1184_vm0, %v1163_v21, %v1162_v18  ;;  %1201 = vst [vmem:[#allocation8] sm:$0x3] %v1185_v34  ;;  %1202 = vst [vmem:[#allocation8 + $0x2] sm:$0x3] %v1186_v16 }
 0x1aa   :  { %v1191_v50 = vsel %vm1184_vm0, %v1165_v29, %v1164_v60  ;;  %v1192_v48 = vsel %vm1184_vm0, %v1167_v62, %v1166_v24  ;;  %1203 = vst [vmem:[#allocation8 + $0x4] sm:$0x3] %v1187_v30  ;;  %1204 = vst [vmem:[#allocation8 + $0x6] sm:$0x3] %v1188_v28 }
 0x1ab   :  { %1205 = vst [vmem:[#allocation8 + $0x8] sm:$0x3] %v1189_v6  ;;  %1206 = vst [vmem:[#allocation8 + $0xa] sm:$0x3] %v1190_v31 }
 0x1ac   :  { %1207 = vst [vmem:[#allocation8 + $0xc] sm:$0x3] %v1191_v50  ;;  %1208 = vst [vmem:[#allocation8 + $0xe] sm:$0x3] %v1192_v48 }
 0x1ad   :  { %1443 = shalt.err (!%p1440_p0)
}
 0x1ae   :  { %s1444_s29 = scalar_lea.hbm %s2268_s3, 256 }
 0x1af   :  { %p1445_p1 = scmp.ne.s32.totalorder %s2268_s3, %s1444_s29  ;;  %p1448_p2 = scmp.lt.u32.totalorder %s1444_s29, %s2268_s3 }
 0x1b1   :  { %p1450_p3 = pnand %p1448_p2, %p1445_p1 }
 0x1b3   :  { %1453 = shalt.err (!%p1450_p3)
}
 0x1b4   :  { %1220 = dma.vmem_to_hbm [thread:$0]  %s1215_s25, 256, %s2268_s3, [#allocation4], %s1461_s22, %s1461_s22, %s1462_s23  }
 0x1b5   :  { %1458 = dma.done.wait [#allocation4], 256  }
 0x1b6   :  { %1459 = vsyncadd [#allocation4], 4294967040 }
 0x1b7   :  { %1224 = vsyncpa [#allocation3], 1 }
 0x1b8   :  { %1225 = vsyncpa [#allocation6], 1 }
 0x1b9   :  { %1226 = vsyncpa [#allocation4], 1 }

</bundles_post_ra>
